<compile_context>
chip_gen: v7x
topology: tpu7x:2x2x1
jax: 0.10.0
libtpu: 0.0.40
codegen_flags: <defaults>
</compile_context>

<pallas_src>
import math

import jax
import jax.numpy as jnp
from jax.experimental import pallas as pl
from jax.experimental.pallas import tpu as pltpu


def _gru_kernel(x_ref, wx_ref, wh_ref, b_ref, wfc_ref, bfc_ref, out_ref, hs_scr):
    """Whole-model forward in one invocation (everything resident in VMEM).

    Refs:
      x_ref  : (B, S, D)    inputs
      wx_ref : (D, 3H)      fused x2h weights, column blocks [r | z | n]
      wh_ref : (H, 3H)      fused h2h weights, column blocks [r | z | n]
      b_ref  : (4, 1, H)    biases: [bx_r + bh_r, bx_z + bh_z, bx_n, bh_n]
      wfc_ref: (H, O)       output-projection weight
      bfc_ref: (1, O)       output-projection bias
      out_ref: (B, S, O)    model output
      hs_scr : (B, S, H)    VMEM scratch collecting per-step hidden states
    """
    B, S, D = x_ref.shape
    H = wh_ref.shape[0]

    x = x_ref[...]
    wx = wx_ref[...]
    wh = wh_ref[...]
    b_r = b_ref[0]       # (1, H)  pre-folded bx_r + bh_r
    b_z = b_ref[1]       # (1, H)  pre-folded bx_z + bh_z
    bx_n = b_ref[2]      # (1, H)
    bh_n = b_ref[3]      # (1, H)

    h = jnp.zeros((B, H), jnp.float32)
    for t in range(S):   # S is small & static: full unroll, h stays in vregs
        x_t = x[:, t, :]                                            # (B, D)
        gx = jnp.dot(x_t, wx, preferred_element_type=jnp.float32)   # (B, 3H)
        gh = jnp.dot(h, wh, preferred_element_type=jnp.float32)     # (B, 3H)
        r = jax.nn.sigmoid(gx[:, 0:H] + gh[:, 0:H] + b_r)
        z = jax.nn.sigmoid(gx[:, H:2 * H] + gh[:, H:2 * H] + b_z)
        n = jnp.tanh(gx[:, 2 * H:] + bx_n + r * (gh[:, 2 * H:] + bh_n))
        h = n + z * (h - n)
        hs_scr[:, t, :] = h

    # Linear head applied once over all hidden states (not per timestep).
    hs = hs_scr[...].reshape(B * S, H)
    out = jnp.dot(hs, wfc_ref[...], preferred_element_type=jnp.float32) + bfc_ref[...]
    out_ref[...] = out.reshape(B, S, -1).astype(out_ref.dtype)


@jax.jit
def gru_model_forward(x, wx, bx, wh, bh, wfc, bfc):
    """x: (B, S, D_in) float32 -> (B, S, D_out) float32.

    wx/bx : (3, D, H) / (3, 1, H)  x2h params, gate order (r, z, n).
    wh/bh : (3, H, H) / (3, 1, H)  h2h params.
    wfc/bfc: (H, O) / (1, O)       output projection.
    """
    B, S, D = x.shape
    H = wh.shape[2]
    O = wfc.shape[1]

    # Fuse gate weights once: (3, D, H) -> (D, 3H), column blocks [r | z | n].
    wx_f = jnp.transpose(wx, (1, 0, 2)).reshape(D, 3 * H)
    wh_f = jnp.transpose(wh, (1, 0, 2)).reshape(H, 3 * H)
    # Pre-fold r/z biases; keep n-gate biases separate (bh_n is gated by r).
    b = jnp.stack([bx[0] + bh[0], bx[1] + bh[1], bx[2], bh[2]], axis=0)  # (4,1,H)

    return pl.pallas_call(
        _gru_kernel,
        out_shape=jax.ShapeDtypeStruct((B, S, O), jnp.float32),
        scratch_shapes=[pltpu.VMEM((B, S, H), jnp.float32)],
    )(x, wx_f, wh_f, b, wfc, bfc)


def _reference_forward(x, wx, bx, wh, bh, wfc, bfc):
    """Plain-JAX reference mirroring the PyTorch forward."""
    B, S, D = x.shape
    H = wh.shape[2]
    h = jnp.zeros((B, H), jnp.float32)
    outs = []
    for t in range(S):
        xt = x[:, t, :]
        i_r = xt @ wx[0] + bx[0]
        i_i = xt @ wx[1] + bx[1]
        i_n = xt @ wx[2] + bx[2]
        h_r = h @ wh[0] + bh[0]
        h_i = h @ wh[1] + bh[1]
        h_n = h @ wh[2] + bh[2]
        r = jax.nn.sigmoid(i_r + h_r)
        z = jax.nn.sigmoid(i_i + h_i)
        n = jnp.tanh(i_n + r * h_n)
        h = n + z * (h - n)
        outs.append(h)
    out = jnp.stack(outs, axis=1)            # (B, S, H)
    return out @ wfc + bfc                   # (B, S, O)


if __name__ == "__main__":
    # Small shapes implied by the module: x is (batch, seq, input_dim).
    B, S, D_IN, H, D_OUT = 4, 8, 16, 32, 10

    key = jax.random.PRNGKey(0)
    k = jax.random.split(key, 8)
    std = 1.0 / math.sqrt(H)

    x = jax.random.normal(k[0], (B, S, D_IN), jnp.float32)

    # GRUCell params (PyTorch Linear weights are (out,in); we store transposed
    # (in,out) per gate and stack the 3 gates on the leading axis: r, i, n).
    wx = jax.random.uniform(k[1], (3, D_IN, H), jnp.float32, -std, std)
    bx = jax.random.uniform(k[2], (3, 1, H), jnp.float32, -std, std)
    wh = jax.random.uniform(k[3], (3, H, H), jnp.float32, -std, std)
    bh = jax.random.uniform(k[4], (3, 1, H), jnp.float32, -std, std)

    # fc: nn.Linear(hidden_dim, output_dim)
    wfc = jax.random.uniform(k[5], (H, D_OUT), jnp.float32, -std, std)
    bfc = jax.random.uniform(k[6], (1, D_OUT), jnp.float32, -std, std)

    out = jax.block_until_ready(gru_model_forward(x, wx, bx, wh, bh, wfc, bfc))

    ref = _reference_forward(x, wx, bx, wh, bh, wfc, bfc)
    assert out.shape == (B, S, D_OUT), out.shape
    assert jnp.allclose(out, ref, atol=1e-5, rtol=1e-5), \
        float(jnp.max(jnp.abs(out - ref)))

    print("KERNEL_OK")
</pallas_src>

<mosaic_0001>
module attributes {stable_mosaic.version = 11 : i64} {
  func.func @_gru_kernel(%arg0: memref<4x8x16xf32, #tpu.memory_space<vmem>>, %arg1: memref<16x96xf32, #tpu.memory_space<vmem>>, %arg2: memref<32x96xf32, #tpu.memory_space<vmem>>, %arg3: memref<4x1x32xf32, #tpu.memory_space<vmem>>, %arg4: memref<32x10xf32, #tpu.memory_space<vmem>>, %arg5: memref<1x10xf32, #tpu.memory_space<vmem>>, %arg6: memref<4x8x10xf32, #tpu.memory_space<vmem>>, %arg7: memref<4x8x32xf32, #tpu.memory_space<vmem>>) attributes {dimension_semantics = [], scalar_prefetch = 0 : i64, scratch_operands = 1 : i64, tpu.core_type = #tpu.core_type<tc>} {
    %c0 = arith.constant 0 : index
    %c0_0 = arith.constant 0 : index
    %c0_1 = arith.constant 0 : index
    %0 = vector.load %arg0[%c0, %c0_0, %c0_1] : memref<4x8x16xf32, #tpu.memory_space<vmem>>, vector<4x8x16xf32>
    %c0_2 = arith.constant 0 : index
    %c0_3 = arith.constant 0 : index
    %1 = vector.load %arg1[%c0_2, %c0_3] : memref<16x96xf32, #tpu.memory_space<vmem>>, vector<16x96xf32>
    %c0_4 = arith.constant 0 : index
    %c0_5 = arith.constant 0 : index
    %2 = vector.load %arg2[%c0_4, %c0_5] : memref<32x96xf32, #tpu.memory_space<vmem>>, vector<32x96xf32>
    %c0_6 = arith.constant 0 : index
    %c0_7 = arith.constant 0 : index
    %c0_8 = arith.constant 0 : index
    %3 = vector.load %arg3[%c0_6, %c0_7, %c0_8] : memref<4x1x32xf32, #tpu.memory_space<vmem>>, vector<1x1x32xf32>
    %4 = vector.shape_cast %3 : vector<1x1x32xf32> to vector<1x32xf32>
    %c1 = arith.constant 1 : index
    %c0_9 = arith.constant 0 : index
    %c0_10 = arith.constant 0 : index
    %5 = vector.load %arg3[%c1, %c0_9, %c0_10] : memref<4x1x32xf32, #tpu.memory_space<vmem>>, vector<1x1x32xf32>
    %6 = vector.shape_cast %5 : vector<1x1x32xf32> to vector<1x32xf32>
    %c2 = arith.constant 2 : index
    %c0_11 = arith.constant 0 : index
    %c0_12 = arith.constant 0 : index
    %7 = vector.load %arg3[%c2, %c0_11, %c0_12] : memref<4x1x32xf32, #tpu.memory_space<vmem>>, vector<1x1x32xf32>
    %8 = vector.shape_cast %7 : vector<1x1x32xf32> to vector<1x32xf32>
    %c3 = arith.constant 3 : index
    %c0_13 = arith.constant 0 : index
    %c0_14 = arith.constant 0 : index
    %9 = vector.load %arg3[%c3, %c0_13, %c0_14] : memref<4x1x32xf32, #tpu.memory_space<vmem>>, vector<1x1x32xf32>
    %10 = vector.shape_cast %9 : vector<1x1x32xf32> to vector<1x32xf32>
    %cst = arith.constant 0.000000e+00 : f32
    %11 = vector.broadcast %cst : f32 to vector<4x32xf32>
    %12 = vector.extract_strided_slice %0 {offsets = [0, 0, 0], sizes = [4, 1, 16], strides = [1, 1, 1]} : vector<4x8x16xf32> to vector<4x1x16xf32>
    %13 = vector.shape_cast %12 : vector<4x1x16xf32> to vector<4x16xf32>
    %cst_15 = arith.constant dense<0.000000e+00> : vector<4x96xf32>
    %14 = tpu.matmul %13, %1, %cst_15 {dimension_numbers = #tpu.dot_dimension_numbers<[1], [0], [0], [1], [0, 0, 1, 1], [], []>} : vector<4x16xf32>, vector<16x96xf32>, vector<4x96xf32> -> vector<4x96xf32>
    %cst_16 = arith.constant dense<0.000000e+00> : vector<4x96xf32>
    %15 = tpu.matmul %11, %2, %cst_16 {dimension_numbers = #tpu.dot_dimension_numbers<[1], [0], [0], [1], [0, 0, 1, 1], [], []>} : vector<4x32xf32>, vector<32x96xf32>, vector<4x96xf32> -> vector<4x96xf32>
    %16 = vector.extract_strided_slice %14 {offsets = [0, 0], sizes = [4, 32], strides = [1, 1]} : vector<4x96xf32> to vector<4x32xf32>
    %17 = vector.extract_strided_slice %15 {offsets = [0, 0], sizes = [4, 32], strides = [1, 1]} : vector<4x96xf32> to vector<4x32xf32>
    %18 = arith.addf %16, %17 : vector<4x32xf32>
    %19 = vector.broadcast %4 : vector<1x32xf32> to vector<4x32xf32>
    %20 = arith.addf %18, %19 : vector<4x32xf32>
    %21 = arith.negf %20 : vector<4x32xf32>
    %22 = math.exp %21 : vector<4x32xf32>
    %cst_17 = arith.constant 1.000000e+00 : f32
    %23 = vector.broadcast %cst_17 : f32 to vector<4x32xf32>
    %24 = arith.addf %23, %22 : vector<4x32xf32>
    %25 = arith.divf %23, %24 : vector<4x32xf32>
    %26 = vector.extract_strided_slice %14 {offsets = [0, 32], sizes = [4, 32], strides = [1, 1]} : vector<4x96xf32> to vector<4x32xf32>
    %27 = vector.extract_strided_slice %15 {offsets = [0, 32], sizes = [4, 32], strides = [1, 1]} : vector<4x96xf32> to vector<4x32xf32>
    %28 = arith.addf %26, %27 : vector<4x32xf32>
    %29 = vector.broadcast %6 : vector<1x32xf32> to vector<4x32xf32>
    %30 = arith.addf %28, %29 : vector<4x32xf32>
    %31 = arith.negf %30 : vector<4x32xf32>
    %32 = math.exp %31 : vector<4x32xf32>
    %cst_18 = arith.constant 1.000000e+00 : f32
    %33 = vector.broadcast %cst_18 : f32 to vector<4x32xf32>
    %34 = arith.addf %33, %32 : vector<4x32xf32>
    %35 = arith.divf %33, %34 : vector<4x32xf32>
    %36 = vector.extract_strided_slice %14 {offsets = [0, 64], sizes = [4, 32], strides = [1, 1]} : vector<4x96xf32> to vector<4x32xf32>
    %37 = vector.broadcast %8 : vector<1x32xf32> to vector<4x32xf32>
    %38 = arith.addf %36, %37 : vector<4x32xf32>
    %39 = vector.extract_strided_slice %15 {offsets = [0, 64], sizes = [4, 32], strides = [1, 1]} : vector<4x96xf32> to vector<4x32xf32>
    %40 = vector.broadcast %10 : vector<1x32xf32> to vector<4x32xf32>
    %41 = arith.addf %39, %40 : vector<4x32xf32>
    %42 = arith.mulf %25, %41 : vector<4x32xf32>
    %43 = arith.addf %38, %42 : vector<4x32xf32>
    %44 = math.tanh %43 : vector<4x32xf32>
    %45 = arith.subf %11, %44 : vector<4x32xf32>
    %46 = arith.mulf %35, %45 : vector<4x32xf32>
    %47 = arith.addf %44, %46 : vector<4x32xf32>
    %c0_19 = arith.constant 0 : index
    %c0_20 = arith.constant 0 : index
    %c0_21 = arith.constant 0 : index
    %48 = vector.load %arg7[%c0_19, %c0_20, %c0_21] : memref<4x8x32xf32, #tpu.memory_space<vmem>>, vector<4x1x32xf32>
    %49 = vector.shape_cast %48 : vector<4x1x32xf32> to vector<4x32xf32>
    %50 = vector.shape_cast %47 : vector<4x32xf32> to vector<4x1x32xf32>
    tpu.vector_store %arg7[%c0_19, %c0_20, %c0_21], %50 {strides = array<i32>} : memref<4x8x32xf32, #tpu.memory_space<vmem>>, vector<4x1x32xf32>,
    %51 = vector.extract_strided_slice %0 {offsets = [0, 1, 0], sizes = [4, 1, 16], strides = [1, 1, 1]} : vector<4x8x16xf32> to vector<4x1x16xf32>
    %52 = vector.shape_cast %51 : vector<4x1x16xf32> to vector<4x16xf32>
    %cst_22 = arith.constant dense<0.000000e+00> : vector<4x96xf32>
    %53 = tpu.matmul %52, %1, %cst_22 {dimension_numbers = #tpu.dot_dimension_numbers<[1], [0], [0], [1], [0, 0, 1, 1], [], []>} : vector<4x16xf32>, vector<16x96xf32>, vector<4x96xf32> -> vector<4x96xf32>
    %cst_23 = arith.constant dense<0.000000e+00> : vector<4x96xf32>
    %54 = tpu.matmul %47, %2, %cst_23 {dimension_numbers = #tpu.dot_dimension_numbers<[1], [0], [0], [1], [0, 0, 1, 1], [], []>} : vector<4x32xf32>, vector<32x96xf32>, vector<4x96xf32> -> vector<4x96xf32>
    %55 = vector.extract_strided_slice %53 {offsets = [0, 0], sizes = [4, 32], strides = [1, 1]} : vector<4x96xf32> to vector<4x32xf32>
    %56 = vector.extract_strided_slice %54 {offsets = [0, 0], sizes = [4, 32], strides = [1, 1]} : vector<4x96xf32> to vector<4x32xf32>
    %57 = arith.addf %55, %56 : vector<4x32xf32>
    %58 = vector.broadcast %4 : vector<1x32xf32> to vector<4x32xf32>
    %59 = arith.addf %57, %58 : vector<4x32xf32>
    %60 = arith.negf %59 : vector<4x32xf32>
    %61 = math.exp %60 : vector<4x32xf32>
    %cst_24 = arith.constant 1.000000e+00 : f32
    %62 = vector.broadcast %cst_24 : f32 to vector<4x32xf32>
    %63 = arith.addf %62, %61 : vector<4x32xf32>
    %64 = arith.divf %62, %63 : vector<4x32xf32>
    %65 = vector.extract_strided_slice %53 {offsets = [0, 32], sizes = [4, 32], strides = [1, 1]} : vector<4x96xf32> to vector<4x32xf32>
    %66 = vector.extract_strided_slice %54 {offsets = [0, 32], sizes = [4, 32], strides = [1, 1]} : vector<4x96xf32> to vector<4x32xf32>
    %67 = arith.addf %65, %66 : vector<4x32xf32>
    %68 = vector.broadcast %6 : vector<1x32xf32> to vector<4x32xf32>
    %69 = arith.addf %67, %68 : vector<4x32xf32>
    %70 = arith.negf %69 : vector<4x32xf32>
    %71 = math.exp %70 : vector<4x32xf32>
    %cst_25 = arith.constant 1.000000e+00 : f32
    %72 = vector.broadcast %cst_25 : f32 to vector<4x32xf32>
    %73 = arith.addf %72, %71 : vector<4x32xf32>
    %74 = arith.divf %72, %73 : vector<4x32xf32>
    %75 = vector.extract_strided_slice %53 {offsets = [0, 64], sizes = [4, 32], strides = [1, 1]} : vector<4x96xf32> to vector<4x32xf32>
    %76 = vector.broadcast %8 : vector<1x32xf32> to vector<4x32xf32>
    %77 = arith.addf %75, %76 : vector<4x32xf32>
    %78 = vector.extract_strided_slice %54 {offsets = [0, 64], sizes = [4, 32], strides = [1, 1]} : vector<4x96xf32> to vector<4x32xf32>
    %79 = vector.broadcast %10 : vector<1x32xf32> to vector<4x32xf32>
    %80 = arith.addf %78, %79 : vector<4x32xf32>
    %81 = arith.mulf %64, %80 : vector<4x32xf32>
    %82 = arith.addf %77, %81 : vector<4x32xf32>
    %83 = math.tanh %82 : vector<4x32xf32>
    %84 = arith.subf %47, %83 : vector<4x32xf32>
    %85 = arith.mulf %74, %84 : vector<4x32xf32>
    %86 = arith.addf %83, %85 : vector<4x32xf32>
    %c0_26 = arith.constant 0 : index
    %c1_27 = arith.constant 1 : index
    %c0_28 = arith.constant 0 : index
    %87 = vector.load %arg7[%c0_26, %c1_27, %c0_28] : memref<4x8x32xf32, #tpu.memory_space<vmem>>, vector<4x1x32xf32>
    %88 = vector.shape_cast %87 : vector<4x1x32xf32> to vector<4x32xf32>
    %89 = vector.shape_cast %86 : vector<4x32xf32> to vector<4x1x32xf32>
    tpu.vector_store %arg7[%c0_26, %c1_27, %c0_28], %89 {strides = array<i32>} : memref<4x8x32xf32, #tpu.memory_space<vmem>>, vector<4x1x32xf32>,
    %90 = vector.extract_strided_slice %0 {offsets = [0, 2, 0], sizes = [4, 1, 16], strides = [1, 1, 1]} : vector<4x8x16xf32> to vector<4x1x16xf32>
    %91 = vector.shape_cast %90 : vector<4x1x16xf32> to vector<4x16xf32>
    %cst_29 = arith.constant dense<0.000000e+00> : vector<4x96xf32>
    %92 = tpu.matmul %91, %1, %cst_29 {dimension_numbers = #tpu.dot_dimension_numbers<[1], [0], [0], [1], [0, 0, 1, 1], [], []>} : vector<4x16xf32>, vector<16x96xf32>, vector<4x96xf32> -> vector<4x96xf32>
    %cst_30 = arith.constant dense<0.000000e+00> : vector<4x96xf32>
    %93 = tpu.matmul %86, %2, %cst_30 {dimension_numbers = #tpu.dot_dimension_numbers<[1], [0], [0], [1], [0, 0, 1, 1], [], []>} : vector<4x32xf32>, vector<32x96xf32>, vector<4x96xf32> -> vector<4x96xf32>
    %94 = vector.extract_strided_slice %92 {offsets = [0, 0], sizes = [4, 32], strides = [1, 1]} : vector<4x96xf32> to vector<4x32xf32>
    %95 = vector.extract_strided_slice %93 {offsets = [0, 0], sizes = [4, 32], strides = [1, 1]} : vector<4x96xf32> to vector<4x32xf32>
    %96 = arith.addf %94, %95 : vector<4x32xf32>
    %97 = vector.broadcast %4 : vector<1x32xf32> to vector<4x32xf32>
    %98 = arith.addf %96, %97 : vector<4x32xf32>
    %99 = arith.negf %98 : vector<4x32xf32>
    %100 = math.exp %99 : vector<4x32xf32>
    %cst_31 = arith.constant 1.000000e+00 : f32
    %101 = vector.broadcast %cst_31 : f32 to vector<4x32xf32>
    %102 = arith.addf %101, %100 : vector<4x32xf32>
    %103 = arith.divf %101, %102 : vector<4x32xf32>
    %104 = vector.extract_strided_slice %92 {offsets = [0, 32], sizes = [4, 32], strides = [1, 1]} : vector<4x96xf32> to vector<4x32xf32>
    %105 = vector.extract_strided_slice %93 {offsets = [0, 32], sizes = [4, 32], strides = [1, 1]} : vector<4x96xf32> to vector<4x32xf32>
    %106 = arith.addf %104, %105 : vector<4x32xf32>
    %107 = vector.broadcast %6 : vector<1x32xf32> to vector<4x32xf32>
    %108 = arith.addf %106, %107 : vector<4x32xf32>
    %109 = arith.negf %108 : vector<4x32xf32>
    %110 = math.exp %109 : vector<4x32xf32>
    %cst_32 = arith.constant 1.000000e+00 : f32
    %111 = vector.broadcast %cst_32 : f32 to vector<4x32xf32>
    %112 = arith.addf %111, %110 : vector<4x32xf32>
    %113 = arith.divf %111, %112 : vector<4x32xf32>
    %114 = vector.extract_strided_slice %92 {offsets = [0, 64], sizes = [4, 32], strides = [1, 1]} : vector<4x96xf32> to vector<4x32xf32>
    %115 = vector.broadcast %8 : vector<1x32xf32> to vector<4x32xf32>
    %116 = arith.addf %114, %115 : vector<4x32xf32>
    %117 = vector.extract_strided_slice %93 {offsets = [0, 64], sizes = [4, 32], strides = [1, 1]} : vector<4x96xf32> to vector<4x32xf32>
    %118 = vector.broadcast %10 : vector<1x32xf32> to vector<4x32xf32>
    %119 = arith.addf %117, %118 : vector<4x32xf32>
    %120 = arith.mulf %103, %119 : vector<4x32xf32>
    %121 = arith.addf %116, %120 : vector<4x32xf32>
    %122 = math.tanh %121 : vector<4x32xf32>
    %123 = arith.subf %86, %122 : vector<4x32xf32>
    %124 = arith.mulf %113, %123 : vector<4x32xf32>
    %125 = arith.addf %122, %124 : vector<4x32xf32>
    %c0_33 = arith.constant 0 : index
    %c2_34 = arith.constant 2 : index
    %c0_35 = arith.constant 0 : index
    %126 = vector.load %arg7[%c0_33, %c2_34, %c0_35] : memref<4x8x32xf32, #tpu.memory_space<vmem>>, vector<4x1x32xf32>
    %127 = vector.shape_cast %126 : vector<4x1x32xf32> to vector<4x32xf32>
    %128 = vector.shape_cast %125 : vector<4x32xf32> to vector<4x1x32xf32>
    tpu.vector_store %arg7[%c0_33, %c2_34, %c0_35], %128 {strides = array<i32>} : memref<4x8x32xf32, #tpu.memory_space<vmem>>, vector<4x1x32xf32>,
    %129 = vector.extract_strided_slice %0 {offsets = [0, 3, 0], sizes = [4, 1, 16], strides = [1, 1, 1]} : vector<4x8x16xf32> to vector<4x1x16xf32>
    %130 = vector.shape_cast %129 : vector<4x1x16xf32> to vector<4x16xf32>
    %cst_36 = arith.constant dense<0.000000e+00> : vector<4x96xf32>
    %131 = tpu.matmul %130, %1, %cst_36 {dimension_numbers = #tpu.dot_dimension_numbers<[1], [0], [0], [1], [0, 0, 1, 1], [], []>} : vector<4x16xf32>, vector<16x96xf32>, vector<4x96xf32> -> vector<4x96xf32>
    %cst_37 = arith.constant dense<0.000000e+00> : vector<4x96xf32>
    %132 = tpu.matmul %125, %2, %cst_37 {dimension_numbers = #tpu.dot_dimension_numbers<[1], [0], [0], [1], [0, 0, 1, 1], [], []>} : vector<4x32xf32>, vector<32x96xf32>, vector<4x96xf32> -> vector<4x96xf32>
    %133 = vector.extract_strided_slice %131 {offsets = [0, 0], sizes = [4, 32], strides = [1, 1]} : vector<4x96xf32> to vector<4x32xf32>
    %134 = vector.extract_strided_slice %132 {offsets = [0, 0], sizes = [4, 32], strides = [1, 1]} : vector<4x96xf32> to vector<4x32xf32>
    %135 = arith.addf %133, %134 : vector<4x32xf32>
    %136 = vector.broadcast %4 : vector<1x32xf32> to vector<4x32xf32>
    %137 = arith.addf %135, %136 : vector<4x32xf32>
    %138 = arith.negf %137 : vector<4x32xf32>
    %139 = math.exp %138 : vector<4x32xf32>
    %cst_38 = arith.constant 1.000000e+00 : f32
    %140 = vector.broadcast %cst_38 : f32 to vector<4x32xf32>
    %141 = arith.addf %140, %139 : vector<4x32xf32>
    %142 = arith.divf %140, %141 : vector<4x32xf32>
    %143 = vector.extract_strided_slice %131 {offsets = [0, 32], sizes = [4, 32], strides = [1, 1]} : vector<4x96xf32> to vector<4x32xf32>
    %144 = vector.extract_strided_slice %132 {offsets = [0, 32], sizes = [4, 32], strides = [1, 1]} : vector<4x96xf32> to vector<4x32xf32>
    %145 = arith.addf %143, %144 : vector<4x32xf32>
    %146 = vector.broadcast %6 : vector<1x32xf32> to vector<4x32xf32>
    %147 = arith.addf %145, %146 : vector<4x32xf32>
    %148 = arith.negf %147 : vector<4x32xf32>
    %149 = math.exp %148 : vector<4x32xf32>
    %cst_39 = arith.constant 1.000000e+00 : f32
    %150 = vector.broadcast %cst_39 : f32 to vector<4x32xf32>
    %151 = arith.addf %150, %149 : vector<4x32xf32>
    %152 = arith.divf %150, %151 : vector<4x32xf32>
    %153 = vector.extract_strided_slice %131 {offsets = [0, 64], sizes = [4, 32], strides = [1, 1]} : vector<4x96xf32> to vector<4x32xf32>
    %154 = vector.broadcast %8 : vector<1x32xf32> to vector<4x32xf32>
    %155 = arith.addf %153, %154 : vector<4x32xf32>
    %156 = vector.extract_strided_slice %132 {offsets = [0, 64], sizes = [4, 32], strides = [1, 1]} : vector<4x96xf32> to vector<4x32xf32>
    %157 = vector.broadcast %10 : vector<1x32xf32> to vector<4x32xf32>
    %158 = arith.addf %156, %157 : vector<4x32xf32>
    %159 = arith.mulf %142, %158 : vector<4x32xf32>
    %160 = arith.addf %155, %159 : vector<4x32xf32>
    %161 = math.tanh %160 : vector<4x32xf32>
    %162 = arith.subf %125, %161 : vector<4x32xf32>
    %163 = arith.mulf %152, %162 : vector<4x32xf32>
    %164 = arith.addf %161, %163 : vector<4x32xf32>
    %c0_40 = arith.constant 0 : index
    %c3_41 = arith.constant 3 : index
    %c0_42 = arith.constant 0 : index
    %165 = vector.load %arg7[%c0_40, %c3_41, %c0_42] : memref<4x8x32xf32, #tpu.memory_space<vmem>>, vector<4x1x32xf32>
    %166 = vector.shape_cast %165 : vector<4x1x32xf32> to vector<4x32xf32>
    %167 = vector.shape_cast %164 : vector<4x32xf32> to vector<4x1x32xf32>
    tpu.vector_store %arg7[%c0_40, %c3_41, %c0_42], %167 {strides = array<i32>} : memref<4x8x32xf32, #tpu.memory_space<vmem>>, vector<4x1x32xf32>,
    %168 = vector.extract_strided_slice %0 {offsets = [0, 4, 0], sizes = [4, 1, 16], strides = [1, 1, 1]} : vector<4x8x16xf32> to vector<4x1x16xf32>
    %169 = vector.shape_cast %168 : vector<4x1x16xf32> to vector<4x16xf32>
    %cst_43 = arith.constant dense<0.000000e+00> : vector<4x96xf32>
    %170 = tpu.matmul %169, %1, %cst_43 {dimension_numbers = #tpu.dot_dimension_numbers<[1], [0], [0], [1], [0, 0, 1, 1], [], []>} : vector<4x16xf32>, vector<16x96xf32>, vector<4x96xf32> -> vector<4x96xf32>
    %cst_44 = arith.constant dense<0.000000e+00> : vector<4x96xf32>
    %171 = tpu.matmul %164, %2, %cst_44 {dimension_numbers = #tpu.dot_dimension_numbers<[1], [0], [0], [1], [0, 0, 1, 1], [], []>} : vector<4x32xf32>, vector<32x96xf32>, vector<4x96xf32> -> vector<4x96xf32>
    %172 = vector.extract_strided_slice %170 {offsets = [0, 0], sizes = [4, 32], strides = [1, 1]} : vector<4x96xf32> to vector<4x32xf32>
    %173 = vector.extract_strided_slice %171 {offsets = [0, 0], sizes = [4, 32], strides = [1, 1]} : vector<4x96xf32> to vector<4x32xf32>
    %174 = arith.addf %172, %173 : vector<4x32xf32>
    %175 = vector.broadcast %4 : vector<1x32xf32> to vector<4x32xf32>
    %176 = arith.addf %174, %175 : vector<4x32xf32>
    %177 = arith.negf %176 : vector<4x32xf32>
    %178 = math.exp %177 : vector<4x32xf32>
    %cst_45 = arith.constant 1.000000e+00 : f32
    %179 = vector.broadcast %cst_45 : f32 to vector<4x32xf32>
    %180 = arith.addf %179, %178 : vector<4x32xf32>
    %181 = arith.divf %179, %180 : vector<4x32xf32>
    %182 = vector.extract_strided_slice %170 {offsets = [0, 32], sizes = [4, 32], strides = [1, 1]} : vector<4x96xf32> to vector<4x32xf32>
    %183 = vector.extract_strided_slice %171 {offsets = [0, 32], sizes = [4, 32], strides = [1, 1]} : vector<4x96xf32> to vector<4x32xf32>
    %184 = arith.addf %182, %183 : vector<4x32xf32>
    %185 = vector.broadcast %6 : vector<1x32xf32> to vector<4x32xf32>
    %186 = arith.addf %184, %185 : vector<4x32xf32>
    %187 = arith.negf %186 : vector<4x32xf32>
    %188 = math.exp %187 : vector<4x32xf32>
    %cst_46 = arith.constant 1.000000e+00 : f32
    %189 = vector.broadcast %cst_46 : f32 to vector<4x32xf32>
    %190 = arith.addf %189, %188 : vector<4x32xf32>
    %191 = arith.divf %189, %190 : vector<4x32xf32>
    %192 = vector.extract_strided_slice %170 {offsets = [0, 64], sizes = [4, 32], strides = [1, 1]} : vector<4x96xf32> to vector<4x32xf32>
    %193 = vector.broadcast %8 : vector<1x32xf32> to vector<4x32xf32>
    %194 = arith.addf %192, %193 : vector<4x32xf32>
    %195 = vector.extract_strided_slice %171 {offsets = [0, 64], sizes = [4, 32], strides = [1, 1]} : vector<4x96xf32> to vector<4x32xf32>
    %196 = vector.broadcast %10 : vector<1x32xf32> to vector<4x32xf32>
    %197 = arith.addf %195, %196 : vector<4x32xf32>
    %198 = arith.mulf %181, %197 : vector<4x32xf32>
    %199 = arith.addf %194, %198 : vector<4x32xf32>
    %200 = math.tanh %199 : vector<4x32xf32>
    %201 = arith.subf %164, %200 : vector<4x32xf32>
    %202 = arith.mulf %191, %201 : vector<4x32xf32>
    %203 = arith.addf %200, %202 : vector<4x32xf32>
    %c0_47 = arith.constant 0 : index
    %c4 = arith.constant 4 : index
    %c0_48 = arith.constant 0 : index
    %204 = vector.load %arg7[%c0_47, %c4, %c0_48] : memref<4x8x32xf32, #tpu.memory_space<vmem>>, vector<4x1x32xf32>
    %205 = vector.shape_cast %204 : vector<4x1x32xf32> to vector<4x32xf32>
    %206 = vector.shape_cast %203 : vector<4x32xf32> to vector<4x1x32xf32>
    tpu.vector_store %arg7[%c0_47, %c4, %c0_48], %206 {strides = array<i32>} : memref<4x8x32xf32, #tpu.memory_space<vmem>>, vector<4x1x32xf32>,
    %207 = vector.extract_strided_slice %0 {offsets = [0, 5, 0], sizes = [4, 1, 16], strides = [1, 1, 1]} : vector<4x8x16xf32> to vector<4x1x16xf32>
    %208 = vector.shape_cast %207 : vector<4x1x16xf32> to vector<4x16xf32>
    %cst_49 = arith.constant dense<0.000000e+00> : vector<4x96xf32>
    %209 = tpu.matmul %208, %1, %cst_49 {dimension_numbers = #tpu.dot_dimension_numbers<[1], [0], [0], [1], [0, 0, 1, 1], [], []>} : vector<4x16xf32>, vector<16x96xf32>, vector<4x96xf32> -> vector<4x96xf32>
    %cst_50 = arith.constant dense<0.000000e+00> : vector<4x96xf32>
    %210 = tpu.matmul %203, %2, %cst_50 {dimension_numbers = #tpu.dot_dimension_numbers<[1], [0], [0], [1], [0, 0, 1, 1], [], []>} : vector<4x32xf32>, vector<32x96xf32>, vector<4x96xf32> -> vector<4x96xf32>
    %211 = vector.extract_strided_slice %209 {offsets = [0, 0], sizes = [4, 32], strides = [1, 1]} : vector<4x96xf32> to vector<4x32xf32>
    %212 = vector.extract_strided_slice %210 {offsets = [0, 0], sizes = [4, 32], strides = [1, 1]} : vector<4x96xf32> to vector<4x32xf32>
    %213 = arith.addf %211, %212 : vector<4x32xf32>
    %214 = vector.broadcast %4 : vector<1x32xf32> to vector<4x32xf32>
    %215 = arith.addf %213, %214 : vector<4x32xf32>
    %216 = arith.negf %215 : vector<4x32xf32>
    %217 = math.exp %216 : vector<4x32xf32>
    %cst_51 = arith.constant 1.000000e+00 : f32
    %218 = vector.broadcast %cst_51 : f32 to vector<4x32xf32>
    %219 = arith.addf %218, %217 : vector<4x32xf32>
    %220 = arith.divf %218, %219 : vector<4x32xf32>
    %221 = vector.extract_strided_slice %209 {offsets = [0, 32], sizes = [4, 32], strides = [1, 1]} : vector<4x96xf32> to vector<4x32xf32>
    %222 = vector.extract_strided_slice %210 {offsets = [0, 32], sizes = [4, 32], strides = [1, 1]} : vector<4x96xf32> to vector<4x32xf32>
    %223 = arith.addf %221, %222 : vector<4x32xf32>
    %224 = vector.broadcast %6 : vector<1x32xf32> to vector<4x32xf32>
    %225 = arith.addf %223, %224 : vector<4x32xf32>
    %226 = arith.negf %225 : vector<4x32xf32>
    %227 = math.exp %226 : vector<4x32xf32>
    %cst_52 = arith.constant 1.000000e+00 : f32
    %228 = vector.broadcast %cst_52 : f32 to vector<4x32xf32>
    %229 = arith.addf %228, %227 : vector<4x32xf32>
    %230 = arith.divf %228, %229 : vector<4x32xf32>
    %231 = vector.extract_strided_slice %209 {offsets = [0, 64], sizes = [4, 32], strides = [1, 1]} : vector<4x96xf32> to vector<4x32xf32>
    %232 = vector.broadcast %8 : vector<1x32xf32> to vector<4x32xf32>
    %233 = arith.addf %231, %232 : vector<4x32xf32>
    %234 = vector.extract_strided_slice %210 {offsets = [0, 64], sizes = [4, 32], strides = [1, 1]} : vector<4x96xf32> to vector<4x32xf32>
    %235 = vector.broadcast %10 : vector<1x32xf32> to vector<4x32xf32>
    %236 = arith.addf %234, %235 : vector<4x32xf32>
    %237 = arith.mulf %220, %236 : vector<4x32xf32>
    %238 = arith.addf %233, %237 : vector<4x32xf32>
    %239 = math.tanh %238 : vector<4x32xf32>
    %240 = arith.subf %203, %239 : vector<4x32xf32>
    %241 = arith.mulf %230, %240 : vector<4x32xf32>
    %242 = arith.addf %239, %241 : vector<4x32xf32>
    %c0_53 = arith.constant 0 : index
    %c5 = arith.constant 5 : index
    %c0_54 = arith.constant 0 : index
    %243 = vector.load %arg7[%c0_53, %c5, %c0_54] : memref<4x8x32xf32, #tpu.memory_space<vmem>>, vector<4x1x32xf32>
    %244 = vector.shape_cast %243 : vector<4x1x32xf32> to vector<4x32xf32>
    %245 = vector.shape_cast %242 : vector<4x32xf32> to vector<4x1x32xf32>
    tpu.vector_store %arg7[%c0_53, %c5, %c0_54], %245 {strides = array<i32>} : memref<4x8x32xf32, #tpu.memory_space<vmem>>, vector<4x1x32xf32>,
    %246 = vector.extract_strided_slice %0 {offsets = [0, 6, 0], sizes = [4, 1, 16], strides = [1, 1, 1]} : vector<4x8x16xf32> to vector<4x1x16xf32>
    %247 = vector.shape_cast %246 : vector<4x1x16xf32> to vector<4x16xf32>
    %cst_55 = arith.constant dense<0.000000e+00> : vector<4x96xf32>
    %248 = tpu.matmul %247, %1, %cst_55 {dimension_numbers = #tpu.dot_dimension_numbers<[1], [0], [0], [1], [0, 0, 1, 1], [], []>} : vector<4x16xf32>, vector<16x96xf32>, vector<4x96xf32> -> vector<4x96xf32>
    %cst_56 = arith.constant dense<0.000000e+00> : vector<4x96xf32>
    %249 = tpu.matmul %242, %2, %cst_56 {dimension_numbers = #tpu.dot_dimension_numbers<[1], [0], [0], [1], [0, 0, 1, 1], [], []>} : vector<4x32xf32>, vector<32x96xf32>, vector<4x96xf32> -> vector<4x96xf32>
    %250 = vector.extract_strided_slice %248 {offsets = [0, 0], sizes = [4, 32], strides = [1, 1]} : vector<4x96xf32> to vector<4x32xf32>
    %251 = vector.extract_strided_slice %249 {offsets = [0, 0], sizes = [4, 32], strides = [1, 1]} : vector<4x96xf32> to vector<4x32xf32>
    %252 = arith.addf %250, %251 : vector<4x32xf32>
    %253 = vector.broadcast %4 : vector<1x32xf32> to vector<4x32xf32>
    %254 = arith.addf %252, %253 : vector<4x32xf32>
    %255 = arith.negf %254 : vector<4x32xf32>
    %256 = math.exp %255 : vector<4x32xf32>
    %cst_57 = arith.constant 1.000000e+00 : f32
    %257 = vector.broadcast %cst_57 : f32 to vector<4x32xf32>
    %258 = arith.addf %257, %256 : vector<4x32xf32>
    %259 = arith.divf %257, %258 : vector<4x32xf32>
    %260 = vector.extract_strided_slice %248 {offsets = [0, 32], sizes = [4, 32], strides = [1, 1]} : vector<4x96xf32> to vector<4x32xf32>
    %261 = vector.extract_strided_slice %249 {offsets = [0, 32], sizes = [4, 32], strides = [1, 1]} : vector<4x96xf32> to vector<4x32xf32>
    %262 = arith.addf %260, %261 : vector<4x32xf32>
    %263 = vector.broadcast %6 : vector<1x32xf32> to vector<4x32xf32>
    %264 = arith.addf %262, %263 : vector<4x32xf32>
    %265 = arith.negf %264 : vector<4x32xf32>
    %266 = math.exp %265 : vector<4x32xf32>
    %cst_58 = arith.constant 1.000000e+00 : f32
    %267 = vector.broadcast %cst_58 : f32 to vector<4x32xf32>
    %268 = arith.addf %267, %266 : vector<4x32xf32>
    %269 = arith.divf %267, %268 : vector<4x32xf32>
    %270 = vector.extract_strided_slice %248 {offsets = [0, 64], sizes = [4, 32], strides = [1, 1]} : vector<4x96xf32> to vector<4x32xf32>
    %271 = vector.broadcast %8 : vector<1x32xf32> to vector<4x32xf32>
    %272 = arith.addf %270, %271 : vector<4x32xf32>
    %273 = vector.extract_strided_slice %249 {offsets = [0, 64], sizes = [4, 32], strides = [1, 1]} : vector<4x96xf32> to vector<4x32xf32>
    %274 = vector.broadcast %10 : vector<1x32xf32> to vector<4x32xf32>
    %275 = arith.addf %273, %274 : vector<4x32xf32>
    %276 = arith.mulf %259, %275 : vector<4x32xf32>
    %277 = arith.addf %272, %276 : vector<4x32xf32>
    %278 = math.tanh %277 : vector<4x32xf32>
    %279 = arith.subf %242, %278 : vector<4x32xf32>
    %280 = arith.mulf %269, %279 : vector<4x32xf32>
    %281 = arith.addf %278, %280 : vector<4x32xf32>
    %c0_59 = arith.constant 0 : index
    %c6 = arith.constant 6 : index
    %c0_60 = arith.constant 0 : index
    %282 = vector.load %arg7[%c0_59, %c6, %c0_60] : memref<4x8x32xf32, #tpu.memory_space<vmem>>, vector<4x1x32xf32>
    %283 = vector.shape_cast %282 : vector<4x1x32xf32> to vector<4x32xf32>
    %284 = vector.shape_cast %281 : vector<4x32xf32> to vector<4x1x32xf32>
    tpu.vector_store %arg7[%c0_59, %c6, %c0_60], %284 {strides = array<i32>} : memref<4x8x32xf32, #tpu.memory_space<vmem>>, vector<4x1x32xf32>,
    %285 = vector.extract_strided_slice %0 {offsets = [0, 7, 0], sizes = [4, 1, 16], strides = [1, 1, 1]} : vector<4x8x16xf32> to vector<4x1x16xf32>
    %286 = vector.shape_cast %285 : vector<4x1x16xf32> to vector<4x16xf32>
    %cst_61 = arith.constant dense<0.000000e+00> : vector<4x96xf32>
    %287 = tpu.matmul %286, %1, %cst_61 {dimension_numbers = #tpu.dot_dimension_numbers<[1], [0], [0], [1], [0, 0, 1, 1], [], []>} : vector<4x16xf32>, vector<16x96xf32>, vector<4x96xf32> -> vector<4x96xf32>
    %cst_62 = arith.constant dense<0.000000e+00> : vector<4x96xf32>
    %288 = tpu.matmul %281, %2, %cst_62 {dimension_numbers = #tpu.dot_dimension_numbers<[1], [0], [0], [1], [0, 0, 1, 1], [], []>} : vector<4x32xf32>, vector<32x96xf32>, vector<4x96xf32> -> vector<4x96xf32>
    %289 = vector.extract_strided_slice %287 {offsets = [0, 0], sizes = [4, 32], strides = [1, 1]} : vector<4x96xf32> to vector<4x32xf32>
    %290 = vector.extract_strided_slice %288 {offsets = [0, 0], sizes = [4, 32], strides = [1, 1]} : vector<4x96xf32> to vector<4x32xf32>
    %291 = arith.addf %289, %290 : vector<4x32xf32>
    %292 = vector.broadcast %4 : vector<1x32xf32> to vector<4x32xf32>
    %293 = arith.addf %291, %292 : vector<4x32xf32>
    %294 = arith.negf %293 : vector<4x32xf32>
    %295 = math.exp %294 : vector<4x32xf32>
    %cst_63 = arith.constant 1.000000e+00 : f32
    %296 = vector.broadcast %cst_63 : f32 to vector<4x32xf32>
    %297 = arith.addf %296, %295 : vector<4x32xf32>
    %298 = arith.divf %296, %297 : vector<4x32xf32>
    %299 = vector.extract_strided_slice %287 {offsets = [0, 32], sizes = [4, 32], strides = [1, 1]} : vector<4x96xf32> to vector<4x32xf32>
    %300 = vector.extract_strided_slice %288 {offsets = [0, 32], sizes = [4, 32], strides = [1, 1]} : vector<4x96xf32> to vector<4x32xf32>
    %301 = arith.addf %299, %300 : vector<4x32xf32>
    %302 = vector.broadcast %6 : vector<1x32xf32> to vector<4x32xf32>
    %303 = arith.addf %301, %302 : vector<4x32xf32>
    %304 = arith.negf %303 : vector<4x32xf32>
    %305 = math.exp %304 : vector<4x32xf32>
    %cst_64 = arith.constant 1.000000e+00 : f32
    %306 = vector.broadcast %cst_64 : f32 to vector<4x32xf32>
    %307 = arith.addf %306, %305 : vector<4x32xf32>
    %308 = arith.divf %306, %307 : vector<4x32xf32>
    %309 = vector.extract_strided_slice %287 {offsets = [0, 64], sizes = [4, 32], strides = [1, 1]} : vector<4x96xf32> to vector<4x32xf32>
    %310 = vector.broadcast %8 : vector<1x32xf32> to vector<4x32xf32>
    %311 = arith.addf %309, %310 : vector<4x32xf32>
    %312 = vector.extract_strided_slice %288 {offsets = [0, 64], sizes = [4, 32], strides = [1, 1]} : vector<4x96xf32> to vector<4x32xf32>
    %313 = vector.broadcast %10 : vector<1x32xf32> to vector<4x32xf32>
    %314 = arith.addf %312, %313 : vector<4x32xf32>
    %315 = arith.mulf %298, %314 : vector<4x32xf32>
    %316 = arith.addf %311, %315 : vector<4x32xf32>
    %317 = math.tanh %316 : vector<4x32xf32>
    %318 = arith.subf %281, %317 : vector<4x32xf32>
    %319 = arith.mulf %308, %318 : vector<4x32xf32>
    %320 = arith.addf %317, %319 : vector<4x32xf32>
    %c0_65 = arith.constant 0 : index
    %c7 = arith.constant 7 : index
    %c0_66 = arith.constant 0 : index
    %321 = vector.load %arg7[%c0_65, %c7, %c0_66] : memref<4x8x32xf32, #tpu.memory_space<vmem>>, vector<4x1x32xf32>
    %322 = vector.shape_cast %321 : vector<4x1x32xf32> to vector<4x32xf32>
    %323 = vector.shape_cast %320 : vector<4x32xf32> to vector<4x1x32xf32>
    tpu.vector_store %arg7[%c0_65, %c7, %c0_66], %323 {strides = array<i32>} : memref<4x8x32xf32, #tpu.memory_space<vmem>>, vector<4x1x32xf32>,
    %c0_67 = arith.constant 0 : index
    %c0_68 = arith.constant 0 : index
    %c0_69 = arith.constant 0 : index
    %324 = vector.load %arg7[%c0_67, %c0_68, %c0_69] : memref<4x8x32xf32, #tpu.memory_space<vmem>>, vector<4x8x32xf32>
    %325 = vector.shape_cast %324 : vector<4x8x32xf32> to vector<32x32xf32>
    %c0_70 = arith.constant 0 : index
    %c0_71 = arith.constant 0 : index
    %326 = vector.load %arg4[%c0_70, %c0_71] : memref<32x10xf32, #tpu.memory_space<vmem>>, vector<32x10xf32>
    %cst_72 = arith.constant dense<0.000000e+00> : vector<32x10xf32>
    %327 = tpu.matmul %325, %326, %cst_72 {dimension_numbers = #tpu.dot_dimension_numbers<[1], [0], [0], [1], [0, 0, 1, 1], [], []>} : vector<32x32xf32>, vector<32x10xf32>, vector<32x10xf32> -> vector<32x10xf32>
    %c0_73 = arith.constant 0 : index
    %c0_74 = arith.constant 0 : index
    %328 = vector.load %arg5[%c0_73, %c0_74] : memref<1x10xf32, #tpu.memory_space<vmem>>, vector<1x10xf32>
    %329 = vector.broadcast %328 : vector<1x10xf32> to vector<32x10xf32>
    %330 = arith.addf %327, %329 : vector<32x10xf32>
    %331 = vector.shape_cast %330 : vector<32x10xf32> to vector<4x8x10xf32>
    %c0_75 = arith.constant 0 : index
    %c0_76 = arith.constant 0 : index
    %c0_77 = arith.constant 0 : index
    %332 = vector.load %arg6[%c0_75, %c0_76, %c0_77] : memref<4x8x10xf32, #tpu.memory_space<vmem>>, vector<4x8x10xf32>
    tpu.vector_store %arg6[%c0_75, %c0_76, %c0_77], %331 {strides = array<i32>} : memref<4x8x10xf32, #tpu.memory_space<vmem>>, vector<4x8x10xf32>,
    return
  }
}

</mosaic_0001>

<bundles_post_ra>
// kernel: gru_model_forward.1
= control target key start
LH: loop header
LB: loop body
LE: loop exit
PB: predicated region body
PF: predicated region fallthrough
CT: control target
= control target key end

     0   :  { %v2668_v3 = vmov 0.0|0.0   ;;  %vm2669_vm0 = vmmov 0   ;;  %v2670_v9 = vmov 0.0   ;;  %vm46_vm1 = vcmask 1041409   ;;  %s3224_s0 = inlined_call_operand.vmem [shape: f32[4,8,16], index: 0, kind: input, shape index: {}]   ;;  %s3225_s1 = inlined_call_operand.vmem [shape: f32[16,96], index: 1, kind: input, shape index: {}]   ;;  %s3226_s2 = inlined_call_operand.vmem [shape: f32[32,96], index: 2, kind: input, shape index: {}]   ;;  %s3227_s3 = inlined_call_operand.vmem [shape: f32[4,1,32], index: 3, kind: input, shape index: {}]   ;;  %s3228_s4 = inlined_call_operand.vmem [shape: f32[32,10], index: 4, kind: input, shape index: {}]   ;;  %s3229_s5 = inlined_call_operand.vmem [shape: f32[1,10], index: 5, kind: input, shape index: {}]   ;;  %s3230_s6 = inlined_call_operand.hbm [shape: f32[4,8,10], index: 6, kind: output, shape index: {}]  }
   0x1   :  { %v30_v0 = vld [vmem:[%s3226_s2] sm:$0xff]  ;;  %v31_v1 = vld [vmem:[%s3226_s2 + $0x8] sm:$0xff]  ;;  %2477 = vmatprep.subr.bf16.mxu1 %v2668_v3  ;;  %2474 = vmatprep.subr.bf16.mxu0 %v2668_v3  ;;  %v32_v6 = vld [vmem:[%s3226_s2 + $0x10] sm:$0xff]  ;;  %vm49_vm2 = vcmask 1042434   ;;  %vm52_vm3 = vcmask 1043459  }
   0x2   :  { %v28_v2 = vld [vmem:[%s3225_s1] sm:$0xff]  ;;  %v2723_v4 = vpack.c.bf16 %v31_v1, %v30_v0  ;;  %v29_v5 = vld [vmem:[%s3225_s1 + $0x8] sm:$0xff]  ;;  %v33_v7 = vld [vmem:[%s3226_s2 + $0x18] sm:$0xff]  ;;  %2320 = vmatprep.mubr.msk.f32.mxu0 %vm2669_vm0, %v2670_v9  ;;  %2331 = vmatprep.mubr.msk.f32.mxu1 %vm2669_vm0, %v2670_v9 }
   0x3   :  { %v2735_v8 = vpack.c.bf16 %v29_v5, %v28_v2  ;;  %v2744_v10 = vld [vmem:[%s3224_s0] sm:$0xff]  ;;  %v2749_v11 = vld [vmem:[%s3224_s0 + $0x8] sm:$0xff]  ;;  %v2754_v12 = vld [vmem:[%s3224_s0 + $0x10] sm:$0xff]  ;;  %v2757_v13 = vpack.c.bf16 %v33_v7, %v32_v6 }
   0x4   :  { %2479 = vmatpush3.bf16.msra.mxu1 %v2723_v4  ;;  %v2762_v14 = vld [vmem:[%s3224_s0 + $0x18] sm:$0xff]  ;;  %v45_v15 = vrot.slane %v2749_v11, 7  ;;  %v48_v16 = vrot.slane %v2754_v12, 6  ;;  %v2210_v17 = vld [vmem:[%s3227_s3 + $0x3] ss:$0 sm:$0xff] }
   0x5   :  { %2480 = vmatprep.subr.bf16.mxu1 %v2668_v3  ;;  %2476 = vmatpush3.bf16.msra.mxu0 %v2735_v8  ;;  %v51_v18 = vrot.slane %v2762_v14, 5  ;;  %v2209_v19 = vld [vmem:[%s3227_s3 + $0x2] ss:$0 sm:$0xff] }
   0x6   :  { %11 = vsyncpa [#allocation4], 0  ;;  %v47_v20 = vsel %vm46_vm1, %v45_v15, %v2744_v10  ;;  %vm54_vm4 = vcmask 130048   ;;  %s2671_s0 = smov 64   ;;  %2483 = vmatprep.subr.bf16.mxu0 %v2668_v3  ;;  %v328_v23 = vrot.slane %v2744_v10, 1  ;;  %v576_v24 = vrot.slane %v2744_v10, 2 }
   0x7   :  { %244 = vrot.lane.b32.xlu0 %v2210_v17, %s2671_s0  ;;  %235 = vrot.lane.b32.xlu1 %v2209_v19, %s2671_s0  ;;  %v50_v21 = vsel %vm49_vm2, %v48_v16, %v47_v20  ;;  %v577_v25 = vrot.slane %v2749_v11, 1  ;;  %v330_v26 = vrot.slane %v2754_v12, 7  ;;  %v332_v28 = vrot.slane %v2762_v14, 6  ;;  %v2207_v42 = vld [vmem:[%s3227_s3 + $0x1] ss:$0 sm:$0xff]  ;;  %s2672_s21 = smov 32  }
   0x8   :  { %2482 = vmatpush3.bf16.msra.mxu1 %v2757_v13  ;;  %v53_v22 = vsel %vm52_vm3, %v51_v18, %v50_v21  ;;  %v329_v27 = vsel %vm46_vm1, %v2749_v11, %v328_v23  ;;  %v580_v30 = vrot.slane %v2762_v14, 7  ;;  %v2833_v43 = vld [vmem:[%s3227_s3] ss:$0 sm:$0xff]  ;;  %s2673_s3 = smov 96   ;;  %v824_v16 = vrot.slane %v2744_v10, 3  ;;  %s2675_s9 = smov [#allocation3]  }
   0x9   :  { %2321 = vmatmul.mubr.msk.f32.vlgmr.msra.gmra.mrb[0].mxu0 %vm54_vm4, %v53_v22  ;;  %2492 = vmatprep.subr.bf16.mxu1 %v2668_v3  ;;  %v578_v29 = vsel %vm46_vm1, %v577_v25, %v576_v24  ;;  %v331_v31 = vsel %vm49_vm2, %v330_v26, %v329_v27  ;;  %v825_v17 = vrot.slane %v2749_v11, 2  ;;  %v827_v18 = vrot.slane %v2754_v12, 1  ;;  %s2190_s1 = sshll.u32 %s2675_s9, 4  ;;  %s2191_s1 = int_to_ptr.vmem [resolvable:$true] %s2190_s1 }
   0xa   :  { %2485 = vmatpush3.bf16.msra.mxu0 %v2735_v8  ;;  %2338 = vmatprep.mubr.msk.f32.mxu0 %vm2669_vm0, %v2670_v9  ;;  %v579_v32 = vsel %vm49_vm2, %v2754_v12, %v578_v29  ;;  %v333_v33 = vsel %vm52_vm3, %v332_v28, %v331_v31  ;;  %vm127_vm5 = vcmask 261120   ;;  %vm323_vm6 = vcmask 253952   ;;  %s2644_s10 = scalar_lea.vmem %s2191_s1, 512  ;;  %p2649_p1 = scmp.lt.s32.totalorder %s2191_s1, %s2191_s1 }
   0xb   :  { %2332 = vmatmul.mubr.f32.vlgmr.msra.gmra.mrb[0].mxu1 %v2670_v9  ;;  %2486 = vmatprep.subr.bf16.mxu0 %v2668_v3  ;;  %v581_v34 = vsel %vm52_vm3, %v580_v30, %v579_v32  ;;  %v826_v19 = vsel %vm46_vm1, %v825_v17, %v824_v16  ;;  %vm2180_vm7 = vcmask 80896   ;;  %p2645_p0 = scmp.ne.s32.totalorder %s2191_s1, %s2644_s10  ;;  %p2650_p2 = scmp.lt.s32.totalorder %s2644_s10, %s2644_s10 }
   0xc   :  { %2494 = vmatpush3.bf16.msra.mxu1 %v2735_v8  ;;  %2356 = vmatprep.mubr.msk.f32.mxu1 %vm2669_vm0, %v2670_v9  ;;  %v828_v20 = vsel %vm49_vm2, %v827_v18, %v826_v19 }
   0xd   :  { %2495 = vmatprep.subr.bf16.mxu1 %v2668_v3  ;;  %2339 = vmatmul.mubr.msk.f32.vlgmr.msra.gmra.mrb[2].mxu0 %vm54_vm4, %v333_v33  ;;  %v829_v22 = vsel %vm52_vm3, %v2762_v14, %v828_v20  ;;  %p2651_p3 = por %p2650_p2, %p2649_p1 }
   0xe   :  { %2488 = vmatpush3.bf16.msra.mxu0 %v2723_v4  ;;  %2349 = vmatprep.mubr.msk.f32.mxu0 %vm2669_vm0, %v2670_v9 }
   0xf   :  { %2357 = vmatmul.mubr.msk.f32.vlgmr.msra.gmra.mrb[2].mxu1 %vm54_vm4, %v581_v34  ;;  %2489 = vmatprep.subr.bf16.mxu0 %v2668_v3  ;;  %p2652_p4 = pnand %p2651_p3, %p2645_p0 }
  0x10   :  { %2497 = vmatpush3.bf16.msra.mxu1 %v2723_v4  ;;  %2367 = vmatprep.mubr.msk.f32.mxu1 %vm2669_vm0, %v2670_v9 }
  0x11   :  { %2498 = vmatprep.subr.bf16.mxu1 %v2668_v3 }
  0x12   :  { %2491 = vmatpush3.bf16.msra.mxu0 %v2757_v13 }
  0x13   :  { %2501 = vmatprep.subr.bf16.mxu0 %v2668_v3 }
  0x14   :  { %2500 = vmatpush3.bf16.msra.mxu1 %v2757_v13 }
  0x15   :  { %2510 = vmatprep.subr.bf16.mxu1 %v2668_v3 }
  0x79   :  { %v2822_v35 = vpop.permute.xlu0 %244  ;;  %v2841_v55 = vpop.permute.xlu1 %235 }
  0xdc   :  { %v123_v36 = vpop.f32.mrb[0].mxu0 }
  0xdd   :  { %v2322_v37 = vpop.f32.mrb[1].mxu0  ;;  %v238_v56 = vadd.f32 %v2841_v55, %v123_v36 }
  0xde   :  { %v197_v38 = vpop.f32.mrb[0].mxu1 }
  0xdf   :  { %v201_v39 = vadd.f32 %v197_v38, %v123_v36  ;;  %v247_v40 = vadd.f32 %v2822_v35, %v197_v38  ;;  %v2333_v41 = vpop.f32.mrb[1].mxu1 }
  0xe0   :  { %v2836_v47 = vpop.f32.mrb[2].mxu0 }
  0xe1   :  { %249 = vrot.lane.b32.xlu0 %v247_v40, %s2671_s0  ;;  %v208_v44 = vadd.f32 %v2833_v43, %v201_v39  ;;  %v2340_v50 = vpop.f32.mrb[3].mxu0  ;;  %v495_v37 = vadd.f32 %v2836_v47, %v2841_v55 }
  0xe2   :  { %v2838_v48 = vpop.f32.mrb[2].mxu1 }
  0xe3   :  { %v2206_v45 = vmul.f32 -1.442695, %v208_v44  ;;  %v2358_v51 = vpop.f32.mrb[3].mxu1 }
  0xe5   :  { %220 = vrot.lane.b32.xlu0 %v2207_v42, %s2672_s21  ;;  %2564 = vpow2.f32 %v2206_v45 }
  0xef   :  { %v2565_v46 = vpop.eup %2564 }
  0xf0   :  { %v212_v49 = vadd.f32 1.0, %v2565_v46 }
  0xf2   :  { %2566 = vrcp.f32 %v212_v49 }
  0xfc   :  { %v2567_v52 = vpop.eup %2566 }
 0x153   :  { %v250_v53 = vpop.permute.xlu0 %249 }
 0x154   :  { %v252_v54 = vmul.f32 %v2567_v52, %v250_v53  ;;  %v1072_v53 = vrot.slane %v2744_v10, 4 }
 0x156   :  { %254 = vrot.lane.b32.xlu1 %v252_v54, %s2671_s0  ;;  %v1073_v54 = vrot.slane %v2749_v11, 3 }
 0x157   :  { %v2845_v61 = vpop.permute.xlu0 %220 }
 0x158   :  { %v223_v62 = vadd.f32 %v2845_v61, %v201_v39 }
 0x15a   :  { %v2208_v63 = vmul.f32 -1.442695, %v223_v62 }
 0x1c8   :  { %v255_v57 = vpop.permute.xlu1 %254 }
 0x1c9   :  { %v257_v58 = vadd.f32 %v255_v57, %v238_v56  ;;  %v1075_v56 = vrot.slane %v2754_v12, 2  ;;  %v1074_v57 = vsel %vm46_vm1, %v1073_v54, %v1072_v53 }
 0x1cb   :  { %2568 = vtanh.f32 %v257_v58  ;;  %v1077_v58 = vrot.slane %v2762_v14, 1 }
 0x1cc   :  { %2570 = vpow2.f32 %v2208_v63 }
 0x1d5   :  { %v2569_v59 = vpop.eup %2568 }
 0x1d6   :  { %v259_v60 = vsub.f32 0.0, %v2569_v59  ;;  %v2571_v0 = vpop.eup %2570 }
 0x1d7   :  { %v227_v1 = vadd.f32 1.0, %v2571_v0 }
 0x1d8   :  { %261 = vrot.lane.b32.xlu1 %v259_v60, %s2673_s3 }
 0x1d9   :  { %2572 = vrcp.f32 %v227_v1 }
 0x1e3   :  { %v2573_v2 = vpop.eup %2572 }
 0x24a   :  { %v262_v5 = vpop.permute.xlu1 %261 }
 0x24b   :  { %v264_v6 = vmul.f32 %v2573_v2, %v262_v5 }
 0x24d   :  { %266 = vrot.lane.b32.xlu0 %v264_v6, %s2672_s21 }
 0x2bf   :  { %v267_v7 = vpop.permute.xlu0 %266 }
 0x2c0   :  { %v2849_v15 = vadd.f32 %v2569_v59, %v267_v7  ;;  %v1076_v59 = vsel %vm49_vm2, %v1075_v56, %v1074_v57 }
 0x2c1   :  { %v1078_v62 = vsel %vm52_vm3, %v1077_v58, %v1076_v59 }
 0x2c2   :  { %406 = vrot.lane.b32.xlu1 %v2849_v15, %s2671_s0 }
 0x334   :  { %v407_v21 = vpop.permute.xlu1 %406 }
 0x335   :  { %2350 = vmatmul.mubr.msk.f32.vlgmr.msra.gmra.mrb[4].mxu0 %vm127_vm5, %v407_v21 }
 0x336   :  { %2503 = vmatpush3.bf16.msra.mxu0 %v2735_v8  ;;  %2374 = vmatprep.mubr.msk.f32.mxu0 %vm2669_vm0, %v2670_v9 }
 0x337   :  { %2504 = vmatprep.subr.bf16.mxu0 %v2668_v3 }
 0x339   :  { %2375 = vmatmul.mubr.msk.f32.vlgmr.msra.gmra.mrb[6].mxu0 %vm54_vm4, %v829_v22  ;;  %v743_v22 = vadd.f32 %v2838_v48, %v2841_v55 }
 0x33a   :  { %2506 = vmatpush3.bf16.msra.mxu0 %v2723_v4  ;;  %2385 = vmatprep.mubr.msk.f32.mxu0 %vm2669_vm0, %v2670_v9 }
 0x33b   :  { %2507 = vmatprep.subr.bf16.mxu0 %v2668_v3 }
 0x33e   :  { %2509 = vmatpush3.bf16.msra.mxu0 %v2757_v13 }
 0x33f   :  { %2519 = vmatprep.subr.bf16.mxu0 %v2668_v3 }
 0x408   :  { %v476_v23 = vpop.f32.mrb[4].mxu0 }
 0x409   :  { %v480_v24 = vadd.f32 %v476_v23, %v2836_v47  ;;  %v496_v25 = vadd.f32 %v476_v23, %v2822_v35  ;;  %v2351_v26 = vpop.f32.mrb[5].mxu0 }
 0x40b   :  { %498 = vrot.lane.b32.xlu0 %v496_v25, %s2671_s0  ;;  %v481_v29 = vadd.f32 %v2833_v43, %v480_v24  ;;  %v488_v42 = vadd.f32 %v480_v24, %v2845_v61 }
 0x40c   :  { %v2875_v27 = vpop.f32.mrb[6].mxu0 }
 0x40d   :  { %v2376_v28 = vpop.f32.mrb[7].mxu0  ;;  %v2213_v30 = vmul.f32 -1.442695, %v481_v29  ;;  %v2214_v44 = vmul.f32 -1.442695, %v488_v42 }
 0x40f   :  { %2574 = vpow2.f32 %v2213_v30 }
 0x419   :  { %v2575_v31 = vpop.eup %2574 }
 0x41a   :  { %v485_v32 = vadd.f32 1.0, %v2575_v31 }
 0x41c   :  { %2576 = vrcp.f32 %v485_v32 }
 0x426   :  { %v2577_v33 = vpop.eup %2576 }
 0x47d   :  { %v499_v34 = vpop.permute.xlu0 %498 }
 0x47e   :  { %v501_v36 = vmul.f32 %v2577_v33, %v499_v34 }
 0x480   :  { %503 = vrot.lane.b32.xlu1 %v501_v36, %s2671_s0 }
 0x4f2   :  { %v504_v38 = vpop.permute.xlu1 %503 }
 0x4f3   :  { %v506_v39 = vadd.f32 %v504_v38, %v495_v37  ;;  %v1321_v37 = vrot.slane %v2744_v10, 5  ;;  %v1322_v38 = vrot.slane %v2749_v11, 4 }
 0x4f5   :  { %2578 = vtanh.f32 %v506_v39  ;;  %v1324_v39 = vrot.slane %v2754_v12, 3 }
 0x4f6   :  { %2580 = vpow2.f32 %v2214_v44 }
 0x4ff   :  { %v2579_v40 = vpop.eup %2578 }
 0x500   :  { %v508_v41 = vsub.f32 %v2849_v15, %v2579_v40  ;;  %v2581_v45 = vpop.eup %2580 }
 0x501   :  { %v492_v46 = vadd.f32 1.0, %v2581_v45 }
 0x502   :  { %510 = vrot.lane.b32.xlu0 %v508_v41, %s2673_s3  ;;  %v1326_v41 = vrot.slane %v2762_v14, 2 }
 0x503   :  { %2582 = vrcp.f32 %v492_v46 }
 0x50d   :  { %v2583_v49 = vpop.eup %2582 }
 0x574   :  { %v511_v50 = vpop.permute.xlu0 %510 }
 0x575   :  { %v513_v51 = vmul.f32 %v2583_v49, %v511_v50 }
 0x577   :  { %515 = vrot.lane.b32.xlu1 %v513_v51, %s2672_s21 }
 0x5e9   :  { %v516_v47 = vpop.permute.xlu1 %515 }
 0x5ea   :  { %v2885_v52 = vadd.f32 %v2579_v40, %v516_v47  ;;  %v1323_v40 = vsel %vm46_vm1, %v1322_v38, %v1321_v37 }
 0x5eb   :  { %v1325_v42 = vsel %vm49_vm2, %v1324_v39, %v1323_v40 }
 0x5ec   :  { %654 = vrot.lane.b32.xlu0 %v2885_v52, %s2671_s0  ;;  %v1327_v45 = vsel %vm52_vm3, %v1326_v41, %v1325_v42 }
 0x65e   :  { %v655_v60 = vpop.permute.xlu0 %654 }
 0x65f   :  { %2368 = vmatmul.mubr.msk.f32.vlgmr.msra.gmra.mrb[4].mxu1 %vm127_vm5, %v655_v60 }
 0x660   :  { %2512 = vmatpush3.bf16.msra.mxu1 %v2735_v8  ;;  %2392 = vmatprep.mubr.msk.f32.mxu1 %vm2669_vm0, %v2670_v9 }
 0x661   :  { %2513 = vmatprep.subr.bf16.mxu1 %v2668_v3 }
 0x663   :  { %2393 = vmatmul.mubr.msk.f32.vlgmr.msra.gmra.mrb[6].mxu1 %vm54_vm4, %v1078_v62 }
 0x664   :  { %2515 = vmatpush3.bf16.msra.mxu1 %v2723_v4  ;;  %2403 = vmatprep.mubr.msk.f32.mxu1 %vm2669_vm0, %v2670_v9 }
 0x665   :  { %2516 = vmatprep.subr.bf16.mxu1 %v2668_v3 }
 0x668   :  { %2518 = vmatpush3.bf16.msra.mxu1 %v2757_v13 }
 0x669   :  { %2528 = vmatprep.subr.bf16.mxu1 %v2668_v3 }
 0x732   :  { %v724_v63 = vpop.f32.mrb[4].mxu1 }
 0x733   :  { %v728_v0 = vadd.f32 %v724_v63, %v2838_v48  ;;  %v744_v1 = vadd.f32 %v724_v63, %v2822_v35  ;;  %v2369_v2 = vpop.f32.mrb[5].mxu1  ;;  %v991_v63 = vadd.f32 %v2875_v27, %v2841_v55 }
 0x735   :  { %746 = vrot.lane.b32.xlu1 %v744_v1, %s2671_s0  ;;  %v729_v7 = vadd.f32 %v2833_v43, %v728_v0  ;;  %v736_v28 = vadd.f32 %v728_v0, %v2845_v61 }
 0x736   :  { %v2911_v5 = vpop.f32.mrb[6].mxu1 }
 0x737   :  { %v2394_v6 = vpop.f32.mrb[7].mxu1  ;;  %v2217_v16 = vmul.f32 -1.442695, %v729_v7  ;;  %v2218_v29 = vmul.f32 -1.442695, %v736_v28  ;;  %v1575_v28 = vrot.slane %v2762_v14, 3 }
 0x739   :  { %2584 = vpow2.f32 %v2217_v16 }
 0x743   :  { %v2585_v17 = vpop.eup %2584 }
 0x744   :  { %v733_v18 = vadd.f32 1.0, %v2585_v17 }
 0x746   :  { %2586 = vrcp.f32 %v733_v18 }
 0x750   :  { %v2587_v19 = vpop.eup %2586 }
 0x7a7   :  { %v747_v20 = vpop.permute.xlu1 %746 }
 0x7a8   :  { %v749_v21 = vmul.f32 %v2587_v19, %v747_v20 }
 0x7aa   :  { %751 = vrot.lane.b32.xlu0 %v749_v21, %s2671_s0 }
 0x81c   :  { %v752_v23 = vpop.permute.xlu0 %751 }
 0x81d   :  { %v754_v24 = vadd.f32 %v752_v23, %v743_v22  ;;  %v1570_v23 = vrot.slane %v2744_v10, 6 }
 0x81f   :  { %2588 = vtanh.f32 %v754_v24  ;;  %v1571_v24 = vrot.slane %v2749_v11, 5 }
 0x820   :  { %2590 = vpow2.f32 %v2218_v29 }
 0x829   :  { %v2589_v25 = vpop.eup %2588 }
 0x82a   :  { %v756_v26 = vsub.f32 %v2885_v52, %v2589_v25  ;;  %v2591_v30 = vpop.eup %2590 }
 0x82b   :  { %v740_v31 = vadd.f32 1.0, %v2591_v30 }
 0x82c   :  { %758 = vrot.lane.b32.xlu1 %v756_v26, %s2673_s3  ;;  %v1572_v26 = vsel %vm46_vm1, %v1571_v24, %v1570_v23 }
 0x82d   :  { %2592 = vrcp.f32 %v740_v31 }
 0x837   :  { %v2593_v32 = vpop.eup %2592 }
 0x89e   :  { %v759_v33 = vpop.permute.xlu1 %758 }
 0x89f   :  { %v761_v34 = vmul.f32 %v2593_v32, %v759_v33 }
 0x8a1   :  { %763 = vrot.lane.b32.xlu0 %v761_v34, %s2672_s21 }
 0x913   :  { %v764_v48 = vpop.permute.xlu0 %763 }
 0x914   :  { %v2921_v36 = vadd.f32 %v2589_v25, %v764_v48  ;;  %v1573_v25 = vrot.slane %v2754_v12, 4 }
 0x916   :  { %902 = vrot.lane.b32.xlu1 %v2921_v36, %s2671_s0  ;;  %v1574_v29 = vsel %vm49_vm2, %v1573_v25, %v1572_v26 }
 0x917   :  { %v1576_v31 = vsel %vm52_vm3, %v1575_v28, %v1574_v29 }
 0x988   :  { %v903_v44 = vpop.permute.xlu1 %902 }
 0x989   :  { %2386 = vmatmul.mubr.msk.f32.vlgmr.msra.gmra.mrb[8].mxu0 %vm127_vm5, %v903_v44 }
 0x98a   :  { %2521 = vmatpush3.bf16.msra.mxu0 %v2735_v8  ;;  %2410 = vmatprep.mubr.msk.f32.mxu0 %vm2669_vm0, %v2670_v9 }
 0x98b   :  { %2522 = vmatprep.subr.bf16.mxu0 %v2668_v3 }
 0x98d   :  { %2411 = vmatmul.mubr.msk.f32.vlgmr.msra.gmra.mrb[10].mxu0 %vm54_vm4, %v1327_v45 }
 0x98e   :  { %2524 = vmatpush3.bf16.msra.mxu0 %v2723_v4  ;;  %2421 = vmatprep.mubr.msk.f32.mxu0 %vm2669_vm0, %v2670_v9 }
 0x98f   :  { %2525 = vmatprep.subr.bf16.mxu0 %v2668_v3 }
 0x992   :  { %2527 = vmatpush3.bf16.msra.mxu0 %v2757_v13 }
 0x993   :  { %2537 = vmatprep.subr.bf16.mxu0 %v2668_v3 }
 0xa5c   :  { %v972_v46 = vpop.f32.mrb[8].mxu0 }
 0xa5d   :  { %v976_v49 = vadd.f32 %v972_v46, %v2875_v27  ;;  %v992_v50 = vadd.f32 %v972_v46, %v2822_v35  ;;  %v2387_v51 = vpop.f32.mrb[9].mxu0 }
 0xa5f   :  { %994 = vrot.lane.b32.xlu0 %v992_v50, %s2671_s0  ;;  %v977_v54 = vadd.f32 %v2833_v43, %v976_v49  ;;  %v984_v7 = vadd.f32 %v976_v49, %v2845_v61  ;;  %v1240_v49 = vadd.f32 %v2911_v5, %v2841_v55 }
 0xa60   :  { %v2947_v47 = vpop.f32.mrb[10].mxu0 }
 0xa61   :  { %v2412_v53 = vpop.f32.mrb[11].mxu0  ;;  %v2221_v56 = vmul.f32 -1.442695, %v977_v54  ;;  %v2222_v16 = vmul.f32 -1.442695, %v984_v7  ;;  %v1489_v24 = vadd.f32 %v2947_v47, %v2841_v55 }
 0xa63   :  { %2594 = vpow2.f32 %v2221_v56 }
 0xa6d   :  { %v2595_v57 = vpop.eup %2594 }
 0xa6e   :  { %v981_v58 = vadd.f32 1.0, %v2595_v57 }
 0xa70   :  { %2596 = vrcp.f32 %v981_v58 }
 0xa7a   :  { %v2597_v59 = vpop.eup %2596 }
 0xad1   :  { %v995_v60 = vpop.permute.xlu0 %994 }
 0xad2   :  { %v997_v62 = vmul.f32 %v2597_v59, %v995_v60 }
 0xad4   :  { %999 = vrot.lane.b32.xlu1 %v997_v62, %s2671_s0 }
 0xb46   :  { %v1000_v0 = vpop.permute.xlu1 %999 }
 0xb47   :  { %v1002_v1 = vadd.f32 %v1000_v0, %v991_v63 }
 0xb49   :  { %2598 = vtanh.f32 %v1002_v1  ;;  %v1819_v1 = vrot.slane %v2744_v10, 7 }
 0xb4a   :  { %2600 = vpow2.f32 %v2222_v16  ;;  %v1824_v16 = vrot.slane %v2762_v14, 4 }
 0xb53   :  { %v2599_v2 = vpop.eup %2598 }
 0xb54   :  { %v1004_v6 = vsub.f32 %v2921_v36, %v2599_v2  ;;  %v2601_v17 = vpop.eup %2600 }
 0xb55   :  { %v988_v18 = vadd.f32 1.0, %v2601_v17 }
 0xb56   :  { %1006 = vrot.lane.b32.xlu0 %v1004_v6, %s2673_s3  ;;  %v1822_v6 = vrot.slane %v2754_v12, 5 }
 0xb57   :  { %2602 = vrcp.f32 %v988_v18 }
 0xb61   :  { %v2603_v19 = vpop.eup %2602 }
 0xbc8   :  { %v1007_v20 = vpop.permute.xlu0 %1006 }
 0xbc9   :  { %v1009_v21 = vmul.f32 %v2603_v19, %v1007_v20 }
 0xbcb   :  { %1011 = vrot.lane.b32.xlu1 %v1009_v21, %s2672_s21 }
 0xc3d   :  { %v1012_v27 = vpop.permute.xlu1 %1011 }
 0xc3e   :  { %v2957_v22 = vadd.f32 %v2599_v2, %v1012_v27  ;;  %v1820_v2 = vrot.slane %v2749_v11, 6 }
 0xc40   :  { %1151 = vrot.lane.b32.xlu0 %v2957_v22, %s2671_s0  ;;  %v1821_v7 = vsel %vm46_vm1, %v1820_v2, %v1819_v1 }
 0xc41   :  { %v1823_v17 = vsel %vm49_vm2, %v1822_v6, %v1821_v7 }
 0xc42   :  { %v1825_v10 = vsel %vm52_vm3, %v1824_v16, %v1823_v17 }
 0xcb2   :  { %v1152_v30 = vpop.permute.xlu0 %1151 }
 0xcb3   :  { %2404 = vmatmul.mubr.msk.f32.vlgmr.msra.gmra.mrb[8].mxu1 %vm127_vm5, %v1152_v30 }
 0xcb4   :  { %2530 = vmatpush3.bf16.msra.mxu1 %v2735_v8  ;;  %2428 = vmatprep.mubr.msk.f32.mxu1 %vm2669_vm0, %v2670_v9 }
 0xcb5   :  { %2531 = vmatprep.subr.bf16.mxu1 %v2668_v3 }
 0xcb7   :  { %2429 = vmatmul.mubr.msk.f32.vlgmr.msra.gmra.mrb[10].mxu1 %vm54_vm4, %v1576_v31 }
 0xcb8   :  { %2533 = vmatpush3.bf16.msra.mxu1 %v2723_v4  ;;  %2439 = vmatprep.mubr.msk.f32.mxu1 %vm2669_vm0, %v2670_v9 }
 0xcb9   :  { %2534 = vmatprep.subr.bf16.mxu1 %v2668_v3 }
 0xcbc   :  { %2536 = vmatpush3.bf16.msra.mxu1 %v2757_v13 }
 0xd86   :  { %v1221_v32 = vpop.f32.mrb[8].mxu1 }
 0xd87   :  { %v1225_v33 = vadd.f32 %v1221_v32, %v2911_v5  ;;  %v1241_v34 = vadd.f32 %v1221_v32, %v2822_v35  ;;  %v2405_v48 = vpop.f32.mrb[9].mxu1 }
 0xd89   :  { %1243 = vrot.lane.b32.xlu1 %v1241_v34, %s2671_s0  ;;  %v1226_v39 = vadd.f32 %v2833_v43, %v1225_v33  ;;  %v1233_v56 = vadd.f32 %v1225_v33, %v2845_v61 }
 0xd8a   :  { %v2982_v37 = vpop.f32.mrb[10].mxu1 }
 0xd8b   :  { %v2430_v38 = vpop.f32.mrb[11].mxu1  ;;  %v2225_v40 = vmul.f32 -1.442695, %v1226_v39  ;;  %v2226_v57 = vmul.f32 -1.442695, %v1233_v56 }
 0xd8d   :  { %2604 = vpow2.f32 %v2225_v40 }
 0xd97   :  { %v2605_v41 = vpop.eup %2604 }
 0xd98   :  { %v1230_v42 = vadd.f32 1.0, %v2605_v41 }
 0xd9a   :  { %2606 = vrcp.f32 %v1230_v42 }
 0xda4   :  { %v2607_v44 = vpop.eup %2606 }
 0xdfb   :  { %v1244_v45 = vpop.permute.xlu1 %1243 }
 0xdfc   :  { %v1246_v46 = vmul.f32 %v2607_v44, %v1244_v45 }
 0xdfe   :  { %1248 = vrot.lane.b32.xlu0 %v1246_v46, %s2671_s0 }
 0xe70   :  { %v1249_v50 = vpop.permute.xlu0 %1248 }
 0xe71   :  { %v1251_v51 = vadd.f32 %v1249_v50, %v1240_v49 }
 0xe73   :  { %2608 = vtanh.f32 %v1251_v51 }
 0xe74   :  { %2610 = vpow2.f32 %v2226_v57  ;;  %v1738_v57 = vadd.f32 %v2982_v37, %v2841_v55 }
 0xe7d   :  { %v2609_v53 = vpop.eup %2608 }
 0xe7e   :  { %v1253_v54 = vsub.f32 %v2957_v22, %v2609_v53  ;;  %v2611_v58 = vpop.eup %2610 }
 0xe7f   :  { %v1237_v59 = vadd.f32 1.0, %v2611_v58 }
 0xe80   :  { %1255 = vrot.lane.b32.xlu1 %v1253_v54, %s2673_s3 }
 0xe81   :  { %2612 = vrcp.f32 %v1237_v59 }
 0xe8b   :  { %v2613_v60 = vpop.eup %2612 }
 0xef2   :  { %v1256_v62 = vpop.permute.xlu1 %1255 }
 0xef3   :  { %v1258_v63 = vmul.f32 %v2613_v60, %v1256_v62 }
 0xef5   :  { %1260 = vrot.lane.b32.xlu0 %v1258_v63, %s2672_s21 }
 0xf67   :  { %v1261_v5 = vpop.permute.xlu0 %1260 }
 0xf68   :  { %v2992_v0 = vadd.f32 %v2609_v53, %v1261_v5 }
 0xf6a   :  { %1400 = vrot.lane.b32.xlu1 %v2992_v0, %s2671_s0 }
 0xfdc   :  { %v1401_v18 = vpop.permute.xlu1 %1400 }
 0xfdd   :  { %2422 = vmatmul.mubr.msk.f32.vlgmr.msra.gmra.mrb[12].mxu0 %vm127_vm5, %v1401_v18 }
 0xfde   :  { %2539 = vmatpush3.bf16.msra.mxu0 %v2735_v8  ;;  %2446 = vmatprep.mubr.msk.f32.mxu0 %vm2669_vm0, %v2670_v9 }
 0xfdf   :  { %2540 = vmatprep.subr.bf16.mxu0 %v2668_v3 }
 0xfe1   :  { %2447 = vmatmul.mubr.msk.f32.vlgmr.msra.gmra.mrb[14].mxu0 %vm54_vm4, %v1825_v10 }
 0xfe2   :  { %2542 = vmatpush3.bf16.msra.mxu0 %v2723_v4  ;;  %2457 = vmatprep.mubr.msk.f32.mxu0 %vm2669_vm0, %v2670_v9 }
 0xfe3   :  { %2543 = vmatprep.subr.bf16.mxu0 %v2668_v3 }
 0xfe6   :  { %2545 = vmatpush3.bf16.msra.mxu0 %v2757_v13 }
0x10b0   :  { %v1470_v11 = vpop.f32.mrb[12].mxu0 }
0x10b1   :  { %v1474_v8 = vadd.f32 %v1470_v11, %v2947_v47  ;;  %v1490_v12 = vadd.f32 %v1470_v11, %v2822_v35  ;;  %v2423_v14 = vpop.f32.mrb[13].mxu0 }
0x10b3   :  { %1492 = vrot.lane.b32.xlu0 %v1490_v12, %s2671_s0  ;;  %v1475_v4 = vadd.f32 %v2833_v43, %v1474_v8  ;;  %v1482_v30 = vadd.f32 %v1474_v8, %v2845_v61 }
0x10b4   :  { %v3017_v19 = vpop.f32.mrb[14].mxu0 }
0x10b5   :  { %v2448_v20 = vpop.f32.mrb[15].mxu0  ;;  %v2229_v21 = vmul.f32 -1.442695, %v1475_v4  ;;  %v2230_v31 = vmul.f32 -1.442695, %v1482_v30 }
0x10b7   :  { %2614 = vpow2.f32 %v2229_v21 }
0x10c1   :  { %v2615_v9 = vpop.eup %2614 }
0x10c2   :  { %v1479_v27 = vadd.f32 1.0, %v2615_v9 }
0x10c4   :  { %2616 = vrcp.f32 %v1479_v27 }
0x10ce   :  { %v2617_v3 = vpop.eup %2616 }
0x1125   :  { %v1493_v13 = vpop.permute.xlu0 %1492 }
0x1126   :  { %v1495_v23 = vmul.f32 %v2617_v3, %v1493_v13  ;;  %v2674_v13 = vmov 1966171168  }
0x1128   :  { %1497 = vrot.lane.b32.xlu1 %v1495_v23, %s2671_s0  ;;  %v272_v23 = vunpack.c.l.s4 %v2674_v13 }
0x119a   :  { %v1498_v25 = vpop.permute.xlu1 %1497 }
0x119b   :  { %v1500_v26 = vadd.f32 %v1498_v25, %v1489_v24  ;;  %v274_v24 = vlaneseq }
0x119d   :  { %2618 = vtanh.f32 %v1500_v26 }
0x119e   :  { %2620 = vpow2.f32 %v2230_v31 }
0x11a7   :  { %v2619_v28 = vpop.eup %2618 }
0x11a8   :  { %v1502_v29 = vsub.f32 %v2992_v0, %v2619_v28  ;;  %v2621_v32 = vpop.eup %2620 }
0x11a9   :  { %v1486_v33 = vadd.f32 1.0, %v2621_v32 }
0x11aa   :  { %1504 = vrot.lane.b32.xlu0 %v1502_v29, %s2673_s3 }
0x11ab   :  { %2622 = vrcp.f32 %v1486_v33 }
0x11b5   :  { %v2623_v34 = vpop.eup %2622 }
0x121c   :  { %v1505_v48 = vpop.permute.xlu0 %1504 }
0x121d   :  { %v1507_v38 = vmul.f32 %v2623_v34, %v1505_v48 }
0x121f   :  { %1509 = vrot.lane.b32.xlu1 %v1507_v38, %s2672_s21 }
0x1291   :  { %v1510_v47 = vpop.permute.xlu1 %1509 }
0x1292   :  { %v3027_v39 = vadd.f32 %v2619_v28, %v1510_v47  ;;  %v273_v28 = vunpack.c.0.s8 %v272_v23 }
0x1294   :  { %1649 = vrot.lane.b32.xlu0 %v3027_v39, %s2671_s0 }
0x1306   :  { %v1650_v40 = vpop.permute.xlu0 %1649 }
0x1307   :  { %2440 = vmatmul.mubr.msk.f32.vlgmr.msra.gmra.mrb[12].mxu1 %vm127_vm5, %v1650_v40 }
0x13da   :  { %v1719_v41 = vpop.f32.mrb[12].mxu1 }
0x13db   :  { %v1723_v42 = vadd.f32 %v1719_v41, %v2982_v37  ;;  %v1739_v44 = vadd.f32 %v1719_v41, %v2822_v35  ;;  %v2441_v45 = vpop.f32.mrb[13].mxu1 }
0x13dd   :  { %1741 = vrot.lane.b32.xlu1 %v1739_v44, %s2671_s0  ;;  %v1724_v46 = vadd.f32 %v2833_v43, %v1723_v42  ;;  %v1731_v63 = vadd.f32 %v1723_v42, %v2845_v61 }
0x13df   :  { %v2233_v49 = vmul.f32 -1.442695, %v1724_v46  ;;  %v2234_v5 = vmul.f32 -1.442695, %v1731_v63 }
0x13e1   :  { %2624 = vpow2.f32 %v2233_v49 }
0x13eb   :  { %v2625_v50 = vpop.eup %2624 }
0x13ec   :  { %v1728_v51 = vadd.f32 1.0, %v2625_v50 }
0x13ee   :  { %2626 = vrcp.f32 %v1728_v51 }
0x13f8   :  { %v2627_v53 = vpop.eup %2626 }
0x144f   :  { %v1742_v54 = vpop.permute.xlu1 %1741 }
0x1450   :  { %v1744_v56 = vmul.f32 %v2627_v53, %v1742_v54 }
0x1452   :  { %1746 = vrot.lane.b32.xlu0 %v1744_v56, %s2671_s0 }
0x14c4   :  { %v1747_v58 = vpop.permute.xlu0 %1746 }
0x14c5   :  { %v1749_v59 = vadd.f32 %v1747_v58, %v1738_v57 }
0x14c7   :  { %2628 = vtanh.f32 %v1749_v59 }
0x14c8   :  { %2630 = vpow2.f32 %v2234_v5 }
0x14d1   :  { %v2629_v60 = vpop.eup %2628 }
0x14d2   :  { %v1751_v62 = vsub.f32 %v3027_v39, %v2629_v60  ;;  %v2631_v1 = vpop.eup %2630 }
0x14d3   :  { %v1735_v2 = vadd.f32 1.0, %v2631_v1 }
0x14d4   :  { %1753 = vrot.lane.b32.xlu1 %v1751_v62, %s2673_s3 }
0x14d5   :  { %2632 = vrcp.f32 %v1735_v2 }
0x14df   :  { %v2633_v6 = vpop.eup %2632 }
0x1546   :  { %v1754_v7 = vpop.permute.xlu1 %1753 }
0x1547   :  { %v1756_v16 = vmul.f32 %v2633_v6, %v1754_v7 }
0x1549   :  { %1758 = vrot.lane.b32.xlu0 %v1756_v16, %s2672_s21 }
0x15bb   :  { %v1759_v37 = vpop.permute.xlu0 %1758 }
0x15bc   :  { %v1761_v17 = vadd.f32 %v2629_v60, %v1759_v37 }
0x15be   :  { %1898 = vrot.lane.b32.xlu1 %v1761_v17, %s2671_s0 }
0x1630   :  { %v1899_v18 = vpop.permute.xlu1 %1898 }
0x1631   :  { %2458 = vmatmul.mubr.msk.f32.vlgmr.msra.gmra.mrb[16].mxu0 %vm127_vm5, %v1899_v18 }
0x1704   :  { %v1968_v10 = vpop.f32.mrb[16].mxu0 }
0x1705   :  { %v3046_v11 = vadd.f32 %v1968_v10, %v3017_v19  ;;  %v1988_v8 = vadd.f32 %v1968_v10, %v2822_v35  ;;  %v2459_v12 = vpop.f32.mrb[17].mxu0  ;;  %v1987_v35 = vadd.f32 %v3017_v19, %v2841_v55 }
0x1707   :  { %1990 = vrot.lane.b32.xlu0 %v1988_v8, %s2671_s0  ;;  %v1973_v14 = vadd.f32 %v2833_v43, %v3046_v11  ;;  %v275_v43 = vshrl.u32 %v274_v24, 7 }
0x1709   :  { %v2237_v20 = vmul.f32 -1.442695, %v1973_v14  ;;  %v3055_v29 = vsub.s32 %v273_v28, %v275_v43  ;;  %v3061_v32 = vsub.s32 0, %v275_v43  ;;  %v1980_v14 = vadd.f32 %v3046_v11, %v2845_v61 }
0x170b   :  { %2634 = vpow2.f32 %v2237_v20  ;;  %v277_v30 = vrot.slane %v2849_v15, %v3055_v29  ;;  %v774_v33 = vrot.slane %v2921_v36, %v3055_v29  ;;  %v1271_v19 = vrot.slane %v2992_v0, %v3055_v29 }
0x170c   :  { %v1769_v38 = vrot.slane %v1761_v17, %v3055_v29  ;;  %v2238_v20 = vmul.f32 -1.442695, %v1980_v14  ;;  %v1022_v13 = vrot.slane %v2957_v22, %v3055_v29  ;;  %v1520_v11 = vrot.slane %v3027_v39, %v3055_v29 }
0x170d   :  { %v285_v55 = vrot.slane %v277_v30, %v3055_v29  ;;  %v782_v15 = vrot.slane %v774_v33, %v3055_v29  ;;  %v1279_v36 = vrot.slane %v1271_v19, %v3055_v29  ;;  %v278_v40 = vcombine.high %v277_v30, %v277_v30 }
0x170e   :  { %v1777_v42 = vrot.slane %v1769_v38, %v3055_v29  ;;  %v775_v0 = vcombine.high %v774_v33, %v774_v33  ;;  %v1272_v46 = vcombine.high %v1271_v19, %v1271_v19  ;;  %v1770_v51 = vcombine.high %v1769_v38, %v1769_v38 }
0x170f   :  { %v298_v48 = vrot.slane %v285_v55, %v3061_v32  ;;  %v795_v47 = vrot.slane %v782_v15, %v3061_v32  ;;  %v1292_v41 = vrot.slane %v1279_v36, %v3061_v32  ;;  %v292_v45 = vrot.slane %v278_v40, %v3055_v29 }
0x1710   :  { %v1790_v44 = vrot.slane %v1777_v42, %v3061_v32  ;;  %v789_v50 = vrot.slane %v775_v0, %v3055_v29  ;;  %v1286_v54 = vrot.slane %v1272_v46, %v3055_v29  ;;  %v1784_v57 = vrot.slane %v1770_v51, %v3055_v29 }
0x1711   :  { %v302_v49 = vrot.slane %v292_v45, %v3061_v32  ;;  %v293_v59 = vcombine.high %v285_v55, %v285_v55  ;;  %v790_v62 = vcombine.high %v782_v15, %v782_v15  ;;  %v1287_v5 = vcombine.high %v1279_v36, %v1279_v36 }
0x1712   :  { %v799_v53 = vrot.slane %v789_v50, %v3061_v32  ;;  %v1296_v56 = vrot.slane %v1286_v54, %v3061_v32  ;;  %v1794_v58 = vrot.slane %v1784_v57, %v3061_v32  ;;  %v1785_v2 = vcombine.high %v1777_v42, %v1777_v42 }
0x1713   :  { %v306_v60 = vrot.slane %v293_v59, %v3061_v32  ;;  %v803_v63 = vrot.slane %v790_v62, %v3061_v32  ;;  %v1300_v1 = vrot.slane %v1287_v5, %v3061_v32  ;;  %v294_v7 = vcombine.high %v292_v45, %v292_v45 }
0x1714   :  { %v1798_v6 = vrot.slane %v1785_v2, %v3061_v32  ;;  %v791_v37 = vcombine.high %v789_v50, %v789_v50  ;;  %v1288_v18 = vcombine.high %v1286_v54, %v1286_v54  ;;  %v1786_v8 = vcombine.high %v1784_v57, %v1784_v57 }
0x1715   :  { %v2635_v4 = vpop.eup %2634  ;;  %v310_v16 = vrot.slane %v294_v7, %v3061_v32  ;;  %v1528_v28 = vrot.slane %v1520_v11, %v3055_v29  ;;  %v1023_v39 = vcombine.high %v1022_v13, %v1022_v13  ;;  %v1521_v55 = vcombine.high %v1520_v11, %v1520_v11  ;;  %v2072_v7 = vld [vmem:[%s3228_s4] sm:$0xff] }
0x1716   :  { %v1977_v21 = vadd.f32 1.0, %v2635_v4  ;;  %v1304_v10 = vrot.slane %v1288_v18, %v3061_v32  ;;  %v1802_v12 = vrot.slane %v1786_v8, %v3061_v32  ;;  %v2075_v8 = vld [vmem:[%s3228_s4 + $0x18] sm:$0xff] }
0x1717   :  { %v1541_v30 = vrot.slane %v1528_v28, %v3061_v32 }
0x1718   :  { %2636 = vrcp.f32 %v1977_v21 }
0x1722   :  { %v2637_v9 = vpop.eup %2636 }
0x1779   :  { %v1991_v27 = vpop.permute.xlu0 %1990 }
0x177a   :  { %v1993_v3 = vmul.f32 %v2637_v9, %v1991_v27  ;;  %v526_v9 = vrot.slane %v2885_v52, %v3055_v29  ;;  %v1030_v52 = vrot.slane %v1022_v13, %v3055_v29 }
0x177c   :  { %1995 = vrot.lane.b32.xlu1 %v1993_v3, %s2671_s0  ;;  %v534_v24 = vrot.slane %v526_v9, %v3055_v29  ;;  %v527_v22 = vcombine.high %v526_v9, %v526_v9 }
0x177e   :  { %v541_v33 = vrot.slane %v527_v22, %v3055_v29 }
0x1780   :  { %v551_v19 = vrot.slane %v541_v33, %v3061_v32 }
0x17ee   :  { %v1996_v25 = vpop.permute.xlu1 %1995 }
0x17ef   :  { %v1998_v26 = vadd.f32 %v1996_v25, %v1987_v35  ;;  %v547_v35 = vrot.slane %v534_v24, %v3061_v32 }
0x17f1   :  { %2638 = vtanh.f32 %v1998_v26  ;;  %v1043_v26 = vrot.slane %v1030_v52, %v3061_v32 }
0x17f2   :  { %2640 = vpow2.f32 %v2238_v20 }
0x17fb   :  { %v3059_v31 = vpop.eup %2638 }
0x17fc   :  { %v2000_v34 = vsub.f32 %v1761_v17, %v3059_v31  ;;  %v807_v17 = vrot.slane %v791_v37, %v3061_v32  ;;  %v2641_v4 = vpop.eup %2640 }
0x17fd   :  { %v1984_v21 = vadd.f32 1.0, %v2641_v4 }
0x17fe   :  { %2002 = vrot.lane.b32.xlu0 %v2000_v34, %s2673_s3 }
0x17ff   :  { %2642 = vrcp.f32 %v1984_v21 }
0x1802   :  { %311 = vrot.lane.b32.xlu0 %v298_v48, %s2671_s0  ;;  %v1037_v48 = vrot.slane %v1023_v39, %v3055_v29 }
0x1804   :  { %v1047_v38 = vrot.slane %v1037_v48, %v3061_v32  ;;  %v1039_v57 = vcombine.high %v1037_v48, %v1037_v48 }
0x1806   :  { %808 = vrot.lane.b32.xlu0 %v795_v47, %s2671_s0  ;;  %v1535_v47 = vrot.slane %v1521_v55, %v3055_v29  ;;  %v1055_v59 = vrot.slane %v1039_v57, %v3061_v32 }
0x1808   :  { %v1545_v40 = vrot.slane %v1535_v47, %v3061_v32 }
0x1809   :  { %v2643_v27 = vpop.eup %2642 }
0x180a   :  { %1305 = vrot.lane.b32.xlu0 %v1292_v41, %s2671_s0  ;;  %v542_v41 = vcombine.high %v534_v24, %v534_v24 }
0x180c   :  { %v555_v0 = vrot.slane %v542_v41, %v3061_v32 }
0x180e   :  { %1803 = vrot.lane.b32.xlu0 %v1790_v44, %s2671_s0  ;;  %v1038_v44 = vcombine.high %v1030_v52, %v1030_v52 }
0x1810   :  { %v1051_v46 = vrot.slane %v1038_v44, %v3061_v32 }
0x1812   :  { %313 = vrot.lane.b32.xlu0 %v302_v49, %s2671_s0  ;;  %v1536_v49 = vcombine.high %v1528_v28, %v1528_v28 }
0x1814   :  { %v1549_v51 = vrot.slane %v1536_v49, %v3061_v32 }
0x1816   :  { %810 = vrot.lane.b32.xlu0 %v799_v53, %s2671_s0  ;;  %v543_v53 = vcombine.high %v541_v33, %v541_v33 }
0x181a   :  { %1307 = vrot.lane.b32.xlu0 %v1296_v56, %s2671_s0  ;;  %v559_v56 = vrot.slane %v543_v53, %v3061_v32 }
0x181e   :  { %1805 = vrot.lane.b32.xlu0 %v1794_v58, %s2671_s0 }
0x1822   :  { %315 = vrot.lane.b32.xlu0 %v306_v60, %s2671_s0  ;;  %v1537_v60 = vcombine.high %v1535_v47, %v1535_v47 }
0x1826   :  { %812 = vrot.lane.b32.xlu0 %v803_v63, %s2671_s0  ;;  %v1553_v63 = vrot.slane %v1537_v60, %v3061_v32 }
0x182a   :  { %1309 = vrot.lane.b32.xlu0 %v1300_v1, %s2671_s0 }
0x182e   :  { %1807 = vrot.lane.b32.xlu0 %v1798_v6, %s2671_s0 }
0x1832   :  { %317 = vrot.lane.b32.xlu0 %v310_v16, %s2671_s0  ;;  %v2073_v16 = vld [vmem:[%s3228_s4 + $0x8] sm:$0xff] }
0x1833   :  { %v2546_v37 = vpack.c.bf16 %v2073_v16, %v2072_v7 }
0x1835   :  { %2547 = vmatprep.subr.bf16.mxu1 %v2546_v37 }
0x1836   :  { %814 = vrot.lane.b32.xlu0 %v807_v17, %s2671_s0  ;;  %2549 = vmatpush3.bf16.msra.mxu1 %v2546_v37 }
0x183a   :  { %1311 = vrot.lane.b32.xlu0 %v1304_v10, %s2671_s0  ;;  %v2074_v10 = vld [vmem:[%s3228_s4 + $0x10] sm:$0xff] }
0x183b   :  { %v2550_v14 = vpack.c.bf16 %v2075_v8, %v2074_v10 }
0x183d   :  { %2551 = vmatprep.subr.bf16.mxu1 %v2550_v14 }
0x183e   :  { %1809 = vrot.lane.b32.xlu0 %v1802_v12, %s2671_s0  ;;  %2553 = vmatpush3.bf16.msra.mxu1 %v2550_v14 }
0x1870   :  { %v2003_v3 = vpop.permute.xlu0 %2002 }
0x1871   :  { %v2005_v23 = vmul.f32 %v2643_v27, %v2003_v3 }
0x1873   :  { %2007 = vrot.lane.b32.xlu1 %v2005_v23, %s2672_s21 }
0x1874   :  { %v312_v61 = vpop.permute.xlu0 %311 }
0x1875   :  { %324 = vst.msk [vmem:[#allocation2] sm:$0x1] %vm323_vm6, %v312_v61 }
0x1877   :  { %560 = vrot.lane.b32.xlu1 %v547_v35, %s2671_s0 }
0x1878   :  { %v809_v25 = vpop.permute.xlu0 %808 }
0x1879   :  { %820 = vst.msk [vmem:[#allocation2 + $0x2] sm:$0x1] %vm323_vm6, %v809_v25 }
0x187b   :  { %1056 = vrot.lane.b32.xlu1 %v1043_v26, %s2671_s0 }
0x187c   :  { %v1306_v43 = vpop.permute.xlu0 %1305 }
0x187d   :  { %1317 = vst.msk [vmem:[#allocation2 + $0x4] sm:$0x1] %vm323_vm6, %v1306_v43 }
0x187f   :  { %1554 = vrot.lane.b32.xlu1 %v1541_v30, %s2671_s0 }
0x1880   :  { %v1804_v34 = vpop.permute.xlu0 %1803 }
0x1881   :  { %1815 = vst.msk [vmem:[#allocation2 + $0x6] sm:$0x1] %vm323_vm6, %v1804_v34 }
0x1883   :  { %562 = vrot.lane.b32.xlu1 %v551_v19, %s2671_s0 }
0x1884   :  { %v314_v15 = vpop.permute.xlu0 %313 }
0x1885   :  { %325 = vst.msk [vmem:[#allocation2 + $0x8] sm:$0x1] %vm323_vm6, %v314_v15 }
0x1887   :  { %1058 = vrot.lane.b32.xlu1 %v1047_v38, %s2671_s0  ;;  %v2239_v38 = vld [vmem:[%s3229_s5] ss:$0 sm:$0xff] }
0x1888   :  { %v811_v36 = vpop.permute.xlu0 %810 }
0x1889   :  { %821 = vst.msk [vmem:[#allocation2 + $0xa] sm:$0x1] %vm323_vm6, %v811_v36 }
0x188b   :  { %1556 = vrot.lane.b32.xlu1 %v1545_v40, %s2671_s0 }
0x188c   :  { %v1308_v42 = vpop.permute.xlu0 %1307 }
0x188d   :  { %1318 = vst.msk [vmem:[#allocation2 + $0xc] sm:$0x1] %vm323_vm6, %v1308_v42 }
0x188f   :  { %564 = vrot.lane.b32.xlu1 %v555_v0, %s2671_s0 }
0x1890   :  { %v1806_v45 = vpop.permute.xlu0 %1805 }
0x1891   :  { %1816 = vst.msk [vmem:[#allocation2 + $0xe] sm:$0x1] %vm323_vm6, %v1806_v45 }
0x1893   :  { %1060 = vrot.lane.b32.xlu1 %v1051_v46, %s2671_s0 }
0x1894   :  { %v316_v50 = vpop.permute.xlu0 %315 }
0x1895   :  { %326 = vst.msk [vmem:[#allocation2 + $0x10] sm:$0x1] %vm323_vm6, %v316_v50 }
0x1897   :  { %1558 = vrot.lane.b32.xlu1 %v1549_v51, %s2671_s0 }
0x1898   :  { %v813_v54 = vpop.permute.xlu0 %812 }
0x1899   :  { %822 = vst.msk [vmem:[#allocation2 + $0x12] sm:$0x1] %vm323_vm6, %v813_v54 }
0x189b   :  { %566 = vrot.lane.b32.xlu1 %v559_v56, %s2671_s0 }
0x189c   :  { %v1310_v58 = vpop.permute.xlu0 %1309 }
0x189d   :  { %1319 = vst.msk [vmem:[#allocation2 + $0x14] sm:$0x1] %vm323_vm6, %v1310_v58 }
0x189f   :  { %1062 = vrot.lane.b32.xlu1 %v1055_v59, %s2671_s0 }
0x18a0   :  { %v1808_v62 = vpop.permute.xlu0 %1807 }
0x18a1   :  { %1817 = vst.msk [vmem:[#allocation2 + $0x16] sm:$0x1] %vm323_vm6, %v1808_v62 }
0x18a3   :  { %1560 = vrot.lane.b32.xlu1 %v1553_v63, %s2671_s0 }
0x18a4   :  { %v318_v5 = vpop.permute.xlu0 %317 }
0x18a5   :  { %327 = vst.msk [vmem:[#allocation2 + $0x18] sm:$0x1] %vm323_vm6, %v318_v5 }
0x18a8   :  { %v815_v1 = vpop.permute.xlu0 %814 }
0x18a9   :  { %823 = vst.msk [vmem:[#allocation2 + $0x1a] sm:$0x1] %vm323_vm6, %v815_v1 }
0x18ac   :  { %v1312_v2 = vpop.permute.xlu0 %1311 }
0x18ad   :  { %1320 = vst.msk [vmem:[#allocation2 + $0x1c] sm:$0x1] %vm323_vm6, %v1312_v2 }
0x18b0   :  { %v1810_v6 = vpop.permute.xlu0 %1809 }
0x18b1   :  { %1818 = vst.msk [vmem:[#allocation2 + $0x1e] sm:$0x1] %vm323_vm6, %v1810_v6 }
0x18e5   :  { %v2008_v17 = vpop.permute.xlu1 %2007 }
0x18e6   :  { %v2010_v18 = vadd.f32 %v3059_v31, %v2008_v17 }
0x18e8   :  { %v2018_v12 = vrot.slane %v2010_v18, %v3055_v29 }
0x18e9   :  { %v561_v20 = vpop.permute.xlu1 %560 }
0x18ea   :  { %v2019_v4 = vcombine.high %v2018_v12, %v2018_v12  ;;  %v2026_v21 = vrot.slane %v2018_v12, %v3055_v29  ;;  %572 = vst.msk [vmem:[#allocation2 + $0x1] sm:$0x1] %vm323_vm6, %v561_v20 }
0x18ec   :  { %v2039_v31 = vrot.slane %v2026_v21, %v3061_v32  ;;  %v2033_v9 = vrot.slane %v2019_v4, %v3055_v29  ;;  %v2034_v13 = vcombine.high %v2026_v21, %v2026_v21 }
0x18ed   :  { %v1057_v27 = vpop.permute.xlu1 %1056 }
0x18ee   :  { %1068 = vst.msk [vmem:[#allocation2 + $0x3] sm:$0x1] %vm323_vm6, %v1057_v27  ;;  %2052 = vrot.lane.b32.xlu1 %v2039_v31, %s2671_s0  ;;  %v2043_v3 = vrot.slane %v2033_v9, %v3061_v32  ;;  %v2047_v24 = vrot.slane %v2034_v13, %v3061_v32  ;;  %v2035_v61 = vcombine.high %v2033_v9, %v2033_v9 }
0x18f0   :  { %v2051_v29 = vrot.slane %v2035_v61, %v3061_v32 }
0x18f1   :  { %v1555_v23 = vpop.permute.xlu1 %1554 }
0x18f2   :  { %1566 = vst.msk [vmem:[#allocation2 + $0x5] sm:$0x1] %vm323_vm6, %v1555_v23  ;;  %2054 = vrot.lane.b32.xlu1 %v2043_v3, %s2671_s0 }
0x18f5   :  { %v563_v11 = vpop.permute.xlu1 %562 }
0x18f6   :  { %573 = vst.msk [vmem:[#allocation2 + $0x9] sm:$0x1] %vm323_vm6, %v563_v11  ;;  %2056 = vrot.lane.b32.xlu1 %v2047_v24, %s2671_s0 }
0x18f9   :  { %v1059_v35 = vpop.permute.xlu1 %1058 }
0x18fa   :  { %1069 = vst.msk [vmem:[#allocation2 + $0xb] sm:$0x1] %vm323_vm6, %v1059_v35  ;;  %2058 = vrot.lane.b32.xlu1 %v2051_v29, %s2671_s0 }
0x18fd   :  { %v1557_v52 = vpop.permute.xlu1 %1556 }
0x18fe   :  { %1567 = vst.msk [vmem:[#allocation2 + $0xd] sm:$0x1] %vm323_vm6, %v1557_v52 }
0x1901   :  { %v565_v25 = vpop.permute.xlu1 %564 }
0x1902   :  { %574 = vst.msk [vmem:[#allocation2 + $0x11] sm:$0x1] %vm323_vm6, %v565_v25 }
0x1905   :  { %v1061_v22 = vpop.permute.xlu1 %1060 }
0x1906   :  { %1070 = vst.msk [vmem:[#allocation2 + $0x13] sm:$0x1] %vm323_vm6, %v1061_v22 }
0x1909   :  { %v1559_v26 = vpop.permute.xlu1 %1558 }
0x190a   :  { %1568 = vst.msk [vmem:[#allocation2 + $0x15] sm:$0x1] %vm323_vm6, %v1559_v26 }
0x190d   :  { %v567_v28 = vpop.permute.xlu1 %566 }
0x190e   :  { %575 = vst.msk [vmem:[#allocation2 + $0x19] sm:$0x1] %vm323_vm6, %v567_v28 }
0x1911   :  { %v1063_v32 = vpop.permute.xlu1 %1062 }
0x1912   :  { %1071 = vst.msk [vmem:[#allocation2 + $0x1b] sm:$0x1] %vm323_vm6, %v1063_v32 }
0x1915   :  { %v1561_v43 = vpop.permute.xlu1 %1560 }
0x1916   :  { %1569 = vst.msk [vmem:[#allocation2 + $0x1d] sm:$0x1] %vm323_vm6, %v1561_v43 }
0x1960   :  { %v2053_v39 = vpop.permute.xlu1 %2052 }
0x1961   :  { %2064 = vst.msk [vmem:[#allocation2 + $0x7] sm:$0x1] %vm323_vm6, %v2053_v39 }
0x1964   :  { %v2055_v30 = vpop.permute.xlu1 %2054 }
0x1965   :  { %2065 = vst.msk [vmem:[#allocation2 + $0xf] sm:$0x1] %vm323_vm6, %v2055_v30 }
0x1968   :  { %v2057_v33 = vpop.permute.xlu1 %2056  ;;  %v2068_v34 = vld [vmem:[#allocation2] sm:$0xff] }
0x1969   :  { %2066 = vst.msk [vmem:[#allocation2 + $0x17] sm:$0x1] %vm323_vm6, %v2057_v33  ;;  %2468 = vmatprep.mubr.msk.f32.mxu1 %vm127_vm5, %v2068_v34 }
0x196c   :  { %v2059_v55 = vpop.permute.xlu1 %2058  ;;  %v2069_v19 = vld [vmem:[#allocation2 + $0x8] sm:$0xff] }
0x196d   :  { %2067 = vst.msk [vmem:[#allocation2 + $0x1f] sm:$0x1] %vm323_vm6, %v2059_v55  ;;  %2469 = vmatmul.mubr.msk.f32.vlgmr.msra.gmra.mrb[14].mxu1 %vm127_vm5, %v2069_v19 }
0x1970   :  { %v2070_v48 = vld [vmem:[#allocation2 + $0x10] sm:$0xff] }
0x1971   :  { %2471 = vmatprep.mubr.msk.f32.mxu1 %vm127_vm5, %v2070_v48 }
0x1974   :  { %v2071_v15 = vld [vmem:[#allocation2 + $0x18] sm:$0xff] }
0x1975   :  { %2472 = vmatmul.mubr.msk.f32.gmra.mrb[16].mxu1 %vm127_vm5, %v2071_v15 }
0x1a40   :  { %v2470_v47 = vpop.f32.mrb[14].mxu1 }
0x1a41   :  { %v2167_v36 = vadd.f32 %v2470_v47, %v2239_v38  ;;  %v2161_v40 = vpop.f32.mrb[15].mxu1 }
0x1a42   :  { %v2162_v41 = vadd.f32 %v2239_v38, %v2161_v40 }
0x1a43   :  { %2182 = vst.msk [vmem:[#allocation3 + $0x8] sm:$0xff] %vm2180_vm7, %v2167_v36 }
0x1a44   :  { %2181 = vst.msk [vmem:[#allocation3] sm:$0xff] %vm2180_vm7, %v2162_v41 }
0x1a48   :  { %v2473_v42 = vpop.f32.mrb[16].mxu1 }
0x1a49   :  { %v2177_v0 = vadd.f32 %v2473_v42, %v2239_v38  ;;  %v2171_v44 = vpop.f32.mrb[17].mxu1 }
0x1a4a   :  { %v2172_v45 = vadd.f32 %v2239_v38, %v2171_v44 }
0x1a4b   :  { %2184 = vst.msk [vmem:[#allocation3 + $0x18] sm:$0xff] %vm2180_vm7, %v2177_v0 }
0x1a4c   :  { %2183 = vst.msk [vmem:[#allocation3 + $0x10] sm:$0xff] %vm2180_vm7, %v2172_v45 }
0x1a4d   :  { %2655 = shalt.err (!%p2652_p4)
}
0x1a4e   :  { %s2656_s2 = scalar_lea.hbm %s3230_s6, 512 }
0x1a4f   :  { %p2657_p5 = scmp.ne.s32.totalorder %s3230_s6, %s2656_s2  ;;  %p2660_p6 = scmp.lt.u32.totalorder %s2656_s2, %s3230_s6 }
0x1a51   :  { %p2662_p7 = pnand %p2660_p6, %p2657_p5 }
0x1a53   :  { %2665 = shalt.err (!%p2662_p7)
}
0x1a54   :  { %s2676_s16 = smov 128   ;;  %s2677_s17 = smov 8  }
0x1a55   :  { %2196 = dma.vmem_to_hbm [thread:$0]  %s2191_s1, 512, %s3230_s6, [#allocation4], %s2676_s16, %s2676_s16, %s2677_s17  }
0x1a56   :  { %2666 = dma.done.wait [#allocation4], 512  }
0x1a57   :  { %2667 = vsyncadd [#allocation4], 4294966784 }
0x1a58   :  { %2200 = vsyncpa [#allocation4], 1 }

</bundles_post_ra>
